<compile_context>
chip_gen: v7x
topology: tpu7x:2x2x1
jax: 0.10.0
libtpu: 0.0.40
codegen_flags: <defaults>
</compile_context>

<pallas_src>
import functools

import jax
import jax.numpy as jnp
import numpy as np
from jax.experimental import pallas as pl
from jax.experimental.pallas import tpu as pltpu

# Hyperparameters (small, consistent with the module's constructor).
STATE_SIZE = 4        # d
CONTROL_SIZE = 2      # c
HIDDEN_LSTM = 32      # hidden_size_lstm
HIDDEN_MLP = 32       # hidden_size_mlp
OUTPUT_SIZE = 16      # output_size (lifted dim N)
TIME_STEP = 8         # m
BATCH = 2

A_ELEMS = OUTPUT_SIZE * OUTPUT_SIZE               # 256
B_ELEMS = OUTPUT_SIZE * CONTROL_SIZE              # 32
OP_DIM = A_ELEMS + B_ELEMS                        # 288
OUT_LANES = 128                                   # lane-dense output slab width


def _elu(x):
    # ELU, alpha = 1.0 (PyTorch default).  exp-based form (known-good lowering).
    return jnp.where(x > 0, x, jnp.exp(jnp.minimum(x, 0.0)) - 1.0)


def _selector_constants():
    """Constant 0/1 matrices used to evaluate the batched bmm without reshapes.

    phi_rep = phi @ tA  gives phi_rep[b, i*N + j] = phi[b, j]
    (opA * phi_rep) @ gA sums lanes sharing the same i  ->  A_tv @ phi.
    Same for the B operator with (c-wide) tB / gB.
    """
    N, c = OUTPUT_SIZE, CONTROL_SIZE
    kA = np.arange(A_ELEMS)
    tA = (kA[None, :] % N == np.arange(N)[:, None]).astype(np.float32)   # (N, N*N)
    gA = (kA[:, None] // N == np.arange(N)[None, :]).astype(np.float32)  # (N*N, N)
    kB = np.arange(B_ELEMS)
    tB = (kB[None, :] % c == np.arange(c)[:, None]).astype(np.float32)   # (c, N*c)
    gB = (kB[:, None] // c == np.arange(N)[None, :]).astype(np.float32)  # (N*c, N)
    return tA, gA, tB, gB


_T_A, _G_A, _T_B, _G_B = _selector_constants()


def lko_fused_kernel(sc_ref, cc_ref, ss_ref, cs_ref,
                     wih_s_ref, wih_c_ref, bl_ref, whh_ref,
                     w1s_ref, w1h_ref, b1_ref, w2_ref, b2_ref,
                     wg_ref, bg_ref, wc_ref, bc_ref,
                     tA_ref, gA_ref, tB_ref, gB_ref,
                     out_ref):
    """Fused forward pass.

    sc_ref : (B, d)       state_current          cc_ref : (B, c) control_current
    ss_ref : (B*T, d)     state_sequence (flat)  cs_ref : (B*T, c)
    wih_s  : (d, 4H)      wih_c : (c, 4H)        whh : (H, 4H)   bl : (1, 4H)
        fused LSTM weights, gate order (i, f, g, o); bl = b_ih + b_hh.
    w1s (d,M), w1h (H,M), b1 (1,M), w2 (M,N), b2 (1,N)   encoder MLP
    wg (H, N*N + N*c), bg (1, N*N + N*c)                 operator generator
    wc (N, d), bc (1, d)                                 C readout
    tA (N, N*N), gA (N*N, N), tB (c, N*c), gB (N*c, N)   constant selectors
    out_ref : (B, 128)   [phi | phi_pred | state_pred | zero pad]
    """
    B = sc_ref.shape[0]
    d = sc_ref.shape[1]
    c = cc_ref.shape[1]
    H = whh_ref.shape[0]
    G4 = whh_ref.shape[1]            # 4*H
    N = w2_ref.shape[1]
    T = ss_ref.shape[0] // B

    # ---- LSTM input projection, hoisted out of the recurrence --------------
    # x_proj[b*T + t, :] = hist[b, t, :] @ Wih_fused + (b_ih + b_hh)
    x_proj = (jnp.dot(ss_ref[...], wih_s_ref[...], preferred_element_type=jnp.float32)
              + jnp.dot(cs_ref[...], wih_c_ref[...], preferred_element_type=jnp.float32)
              + bl_ref[...])                                   # (B*T, 4H)
    x_proj = x_proj.reshape(B, T, G4)

    # Per-lane scale/offset so ONE tanh per step yields sigmoid for (i, f, o)
    # and tanh for g:   sigmoid(x) = 0.5 * tanh(0.5 * x) + 0.5
    lane = jax.lax.broadcasted_iota(jnp.int32, (1, G4), 1)
    is_tanh_gate = (lane >= 2 * H) & (lane < 3 * H)            # g-gate lanes
    scale = jnp.where(is_tanh_gate, 1.0, 0.5).astype(jnp.float32)
    offset = jnp.where(is_tanh_gate, 0.0, 0.5).astype(jnp.float32)

    whh = whh_ref[...]                                         # hoist load

    h = None
    c_state = None
    for t in range(T):                                         # static unroll, T = 8
        gates = x_proj[:, t, :]                                # (B, 4H)
        if h is not None:
            gates = gates + jnp.dot(h, whh, preferred_element_type=jnp.float32)
        act = jnp.tanh(gates * scale) * scale + offset         # one EUP slab op
        i_g = act[:, 0:H]
        f_g = act[:, H:2 * H]
        g_g = act[:, 2 * H:3 * H]
        o_g = act[:, 3 * H:4 * H]
        c_state = i_g * g_g if c_state is None else f_g * c_state + i_g * g_g
        h = o_g * jnp.tanh(c_state)

    # ---- encoder MLP on cat([state_current, h_last]) (split-weight trick) --
    z1 = (jnp.dot(sc_ref[...], w1s_ref[...], preferred_element_type=jnp.float32)
          + jnp.dot(h, w1h_ref[...], preferred_element_type=jnp.float32)
          + b1_ref[...])
    phi = _elu(jnp.dot(_elu(z1), w2_ref[...], preferred_element_type=jnp.float32)
               + b2_ref[...])                                  # (B, N)

    # ---- time-varying operators + one-step Koopman prediction --------------
    op = jnp.dot(h, wg_ref[...], preferred_element_type=jnp.float32) + bg_ref[...]
    opA = op[:, :N * N]                                        # flat A_tv (row-major i*N+j)
    opB = op[:, N * N:N * N + N * c]                           # flat B_tv (row-major i*c+j)

    u = cc_ref[...]
    phi_rep = jnp.dot(phi, tA_ref[...], preferred_element_type=jnp.float32)  # (B, N*N)
    u_rep = jnp.dot(u, tB_ref[...], preferred_element_type=jnp.float32)      # (B, N*c)
    phi_pred = (jnp.dot(opA * phi_rep, gA_ref[...], preferred_element_type=jnp.float32)
                + jnp.dot(opB * u_rep, gB_ref[...], preferred_element_type=jnp.float32))

    state_pred = (jnp.dot(phi_pred, wc_ref[...], preferred_element_type=jnp.float32)
                  + bc_ref[...])

    # ---- single lane-dense output slab --------------------------------------
    out_ref[...] = jnp.zeros(out_ref.shape, out_ref.dtype)
    out_ref[:, 0:N] = phi
    out_ref[:, N:2 * N] = phi_pred
    out_ref[:, 2 * N:2 * N + d] = state_pred


def lko_forward(params, state_current, control_current,
                state_sequence, control_sequence):
    B = state_current.shape[0]
    T = state_sequence.shape[1]
    d, c, N = STATE_SIZE, CONTROL_SIZE, OUTPUT_SIZE

    # Free bitcasts (row-major); no concat / transpose materialized.
    ss_flat = state_sequence.reshape(B * T, d)
    cs_flat = control_sequence.reshape(B * T, c)

    inputs = (state_current, control_current, ss_flat, cs_flat,
              params["wih_s"], params["wih_c"], params["bl"], params["whh"],
              params["w1s"], params["w1h"], params["b1"],
              params["w2"], params["b2"],
              params["wg"], params["bg"],
              params["wc"], params["bc"],
              _T_A, _G_A, _T_B, _G_B)

    vmem_spec = pl.BlockSpec(memory_space=pltpu.MemorySpace.VMEM)
    out = pl.pallas_call(
        lko_fused_kernel,
        out_shape=jax.ShapeDtypeStruct((B, OUT_LANES), jnp.float32),
        in_specs=[vmem_spec] * len(inputs),
        out_specs=vmem_spec,
    )(*inputs)

    phi_current = out[:, :N]
    phi_pred = out[:, N:2 * N]
    state_pred = out[:, 2 * N:2 * N + d]
    return phi_current, phi_pred, state_pred


def init_params(key):
    d, c, H, M, N = STATE_SIZE, CONTROL_SIZE, HIDDEN_LSTM, HIDDEN_MLP, OUTPUT_SIZE
    G4 = 4 * H
    ks = jax.random.split(key, 13)
    scale = 0.1

    def w(k, shape):
        return scale * jax.random.normal(k, shape, jnp.float32)

    return dict(
        # Fused LSTM weights, gate order (i, f, g, o) along the 4H axis;
        # input weight split into state / control halves (avoids any concat).
        wih_s=w(ks[0], (d, G4)),
        wih_c=w(ks[1], (c, G4)),
        whh=w(ks[2], (H, G4)),
        bl=w(ks[3], (1, G4)),            # b_ih + b_hh combined
        # base_mlp: Linear(d + H -> M), ELU, Linear(M -> N), ELU
        w1s=w(ks[4], (d, M)),
        w1h=w(ks[5], (H, M)),
        b1=w(ks[6], (1, M)),
        w2=w(ks[7], (M, N)),
        b2=w(ks[8], (1, N)),
        # operator_generator_fc: Linear(H -> N*N + N*c), torch-style flat layout
        wg=w(ks[9], (H, OP_DIM)),
        bg=w(ks[10], (1, OP_DIM)),
        # C: Linear(N -> d)
        wc=w(ks[11], (N, d)),
        bc=w(ks[12], (1, d)),
    )


def reference_forward(params, state_current, control_current,
                      state_sequence, control_sequence):
    """Pure-JAX reference (same math as the PyTorch module)."""
    d, c, H, N = STATE_SIZE, CONTROL_SIZE, HIDDEN_LSTM, OUTPUT_SIZE
    B, T, _ = state_sequence.shape
    hist = jnp.concatenate([state_sequence, control_sequence], axis=2)
    wih = jnp.concatenate([params["wih_s"], params["wih_c"]], axis=0)   # (d+c, 4H)
    h = jnp.zeros((B, H), jnp.float32)
    cc = jnp.zeros((B, H), jnp.float32)
    for t in range(T):
        gates = hist[:, t, :] @ wih + h @ params["whh"] + params["bl"]
        i_g = jax.nn.sigmoid(gates[:, 0:H])
        f_g = jax.nn.sigmoid(gates[:, H:2 * H])
        g_g = jnp.tanh(gates[:, 2 * H:3 * H])
        o_g = jax.nn.sigmoid(gates[:, 3 * H:4 * H])
        cc = f_g * cc + i_g * g_g
        h = o_g * jnp.tanh(cc)
    z1 = state_current @ params["w1s"] + h @ params["w1h"] + params["b1"]
    phi = jax.nn.elu(jax.nn.elu(z1) @ params["w2"] + params["b2"])
    op = h @ params["wg"] + params["bg"]
    A_tv = op[:, :N * N].reshape(B, N, N)
    B_tv = op[:, N * N:].reshape(B, N, c)
    phi_pred = (jnp.einsum("bij,bj->bi", A_tv, phi)
                + jnp.einsum("bij,bj->bi", B_tv, control_current))
    state_pred = phi_pred @ params["wc"] + params["bc"]
    return phi, phi_pred, state_pred


if __name__ == "__main__":
    key = jax.random.PRNGKey(0)
    kp, k1, k2, k3, k4 = jax.random.split(key, 5)
    params = init_params(kp)

    state_current = jax.random.normal(k1, (BATCH, STATE_SIZE), jnp.float32)
    control_current = jax.random.normal(k2, (BATCH, CONTROL_SIZE), jnp.float32)
    state_sequence = jax.random.normal(k3, (BATCH, TIME_STEP, STATE_SIZE), jnp.float32)
    control_sequence = jax.random.normal(k4, (BATCH, TIME_STEP, CONTROL_SIZE), jnp.float32)

    fwd = jax.jit(functools.partial(lko_forward, params))
    phi_current, phi_pred, state_pred = fwd(
        state_current, control_current, state_sequence, control_sequence)
    jax.block_until_ready((phi_current, phi_pred, state_pred))

    ref_phi, ref_phi_pred, ref_state_pred = reference_forward(
        params, state_current, control_current, state_sequence, control_sequence)
    np.testing.assert_allclose(np.asarray(phi_current), np.asarray(ref_phi),
                               rtol=1e-4, atol=1e-4)
    np.testing.assert_allclose(np.asarray(phi_pred), np.asarray(ref_phi_pred),
                               rtol=1e-4, atol=1e-4)
    np.testing.assert_allclose(np.asarray(state_pred), np.asarray(ref_state_pred),
                               rtol=1e-4, atol=1e-4)

    print("KERNEL_OK")
</pallas_src>

<mosaic_0001>
module attributes {stable_mosaic.version = 11 : i64} {
  func.func @lko_fused_kernel(%arg0: memref<2x4xf32, #tpu.memory_space<vmem>>, %arg1: memref<2x2xf32, #tpu.memory_space<vmem>>, %arg2: memref<16x4xf32, #tpu.memory_space<vmem>>, %arg3: memref<16x2xf32, #tpu.memory_space<vmem>>, %arg4: memref<4x128xf32, #tpu.memory_space<vmem>>, %arg5: memref<2x128xf32, #tpu.memory_space<vmem>>, %arg6: memref<1x128xf32, #tpu.memory_space<vmem>>, %arg7: memref<32x128xf32, #tpu.memory_space<vmem>>, %arg8: memref<4x32xf32, #tpu.memory_space<vmem>>, %arg9: memref<32x32xf32, #tpu.memory_space<vmem>>, %arg10: memref<1x32xf32, #tpu.memory_space<vmem>>, %arg11: memref<32x16xf32, #tpu.memory_space<vmem>>, %arg12: memref<1x16xf32, #tpu.memory_space<vmem>>, %arg13: memref<32x288xf32, #tpu.memory_space<vmem>>, %arg14: memref<1x288xf32, #tpu.memory_space<vmem>>, %arg15: memref<16x4xf32, #tpu.memory_space<vmem>>, %arg16: memref<1x4xf32, #tpu.memory_space<vmem>>, %arg17: memref<16x256xf32, #tpu.memory_space<vmem>>, %arg18: memref<256x16xf32, #tpu.memory_space<vmem>>, %arg19: memref<2x32xf32, #tpu.memory_space<vmem>>, %arg20: memref<32x16xf32, #tpu.memory_space<vmem>>, %arg21: memref<2x128xf32, #tpu.memory_space<vmem>>) attributes {dimension_semantics = [], scalar_prefetch = 0 : i64, scratch_operands = 0 : i64, tpu.core_type = #tpu.core_type<tc>} {
    %c0 = arith.constant 0 : index
    %c0_0 = arith.constant 0 : index
    %0 = vector.load %arg2[%c0, %c0_0] : memref<16x4xf32, #tpu.memory_space<vmem>>, vector<16x4xf32>
    %c0_1 = arith.constant 0 : index
    %c0_2 = arith.constant 0 : index
    %1 = vector.load %arg4[%c0_1, %c0_2] : memref<4x128xf32, #tpu.memory_space<vmem>>, vector<4x128xf32>
    %cst = arith.constant dense<0.000000e+00> : vector<16x128xf32>
    %2 = tpu.matmul %0, %1, %cst {dimension_numbers = #tpu.dot_dimension_numbers<[1], [0], [0], [1], [0, 0, 1, 1], [], []>} : vector<16x4xf32>, vector<4x128xf32>, vector<16x128xf32> -> vector<16x128xf32>
    %c0_3 = arith.constant 0 : index
    %c0_4 = arith.constant 0 : index
    %3 = vector.load %arg3[%c0_3, %c0_4] : memref<16x2xf32, #tpu.memory_space<vmem>>, vector<16x2xf32>
    %c0_5 = arith.constant 0 : index
    %c0_6 = arith.constant 0 : index
    %4 = vector.load %arg5[%c0_5, %c0_6] : memref<2x128xf32, #tpu.memory_space<vmem>>, vector<2x128xf32>
    %cst_7 = arith.constant dense<0.000000e+00> : vector<16x128xf32>
    %5 = tpu.matmul %3, %4, %cst_7 {dimension_numbers = #tpu.dot_dimension_numbers<[1], [0], [0], [1], [0, 0, 1, 1], [], []>} : vector<16x2xf32>, vector<2x128xf32>, vector<16x128xf32> -> vector<16x128xf32>
    %6 = arith.addf %2, %5 : vector<16x128xf32>
    %c0_8 = arith.constant 0 : index
    %c0_9 = arith.constant 0 : index
    %7 = vector.load %arg6[%c0_8, %c0_9] : memref<1x128xf32, #tpu.memory_space<vmem>>, vector<1x128xf32>
    %8 = vector.broadcast %7 : vector<1x128xf32> to vector<16x128xf32>
    %9 = arith.addf %6, %8 : vector<16x128xf32>
    %10 = vector.shape_cast %9 : vector<16x128xf32> to vector<2x8x128xf32>
    %11 = tpu.iota {dimensions = array<i32: 1>} : vector<1x128xi32>
    %c64_i32 = arith.constant 64 : i32
    %12 = vector.broadcast %c64_i32 : i32 to vector<1x128xi32>
    %13 = arith.cmpi sge, %11, %12 : vector<1x128xi32>
    %c96_i32 = arith.constant 96 : i32
    %14 = vector.broadcast %c96_i32 : i32 to vector<1x128xi32>
    %15 = arith.cmpi slt, %11, %14 : vector<1x128xi32>
    %16 = arith.andi %13, %15 : vector<1x128xi1>
    %cst_10 = arith.constant 1.000000e+00 : f32
    %cst_11 = arith.constant 5.000000e-01 : f32
    %17 = vector.broadcast %cst_10 : f32 to vector<1x128xf32>
    %18 = vector.broadcast %cst_11 : f32 to vector<1x128xf32>
    %19 = arith.select %16, %17, %18 : vector<1x128xi1>, vector<1x128xf32>
    %cst_12 = arith.constant 0.000000e+00 : f32
    %cst_13 = arith.constant 5.000000e-01 : f32
    %20 = vector.broadcast %cst_12 : f32 to vector<1x128xf32>
    %21 = vector.broadcast %cst_13 : f32 to vector<1x128xf32>
    %22 = arith.select %16, %20, %21 : vector<1x128xi1>, vector<1x128xf32>
    %c0_14 = arith.constant 0 : index
    %c0_15 = arith.constant 0 : index
    %23 = vector.load %arg7[%c0_14, %c0_15] : memref<32x128xf32, #tpu.memory_space<vmem>>, vector<32x128xf32>
    %24 = vector.extract_strided_slice %10 {offsets = [0, 0, 0], sizes = [2, 1, 128], strides = [1, 1, 1]} : vector<2x8x128xf32> to vector<2x1x128xf32>
    %25 = vector.shape_cast %24 : vector<2x1x128xf32> to vector<2x128xf32>
    %26 = vector.broadcast %19 : vector<1x128xf32> to vector<2x128xf32>
    %27 = arith.mulf %25, %26 : vector<2x128xf32>
    %28 = math.tanh %27 : vector<2x128xf32>
    %29 = vector.broadcast %19 : vector<1x128xf32> to vector<2x128xf32>
    %30 = arith.mulf %28, %29 : vector<2x128xf32>
    %31 = vector.broadcast %22 : vector<1x128xf32> to vector<2x128xf32>
    %32 = arith.addf %30, %31 : vector<2x128xf32>
    %33 = vector.extract_strided_slice %32 {offsets = [0, 0], sizes = [2, 32], strides = [1, 1]} : vector<2x128xf32> to vector<2x32xf32>
    %34 = vector.extract_strided_slice %32 {offsets = [0, 64], sizes = [2, 32], strides = [1, 1]} : vector<2x128xf32> to vector<2x32xf32>
    %35 = vector.extract_strided_slice %32 {offsets = [0, 96], sizes = [2, 32], strides = [1, 1]} : vector<2x128xf32> to vector<2x32xf32>
    %36 = arith.mulf %33, %34 : vector<2x32xf32>
    %37 = math.tanh %36 : vector<2x32xf32>
    %38 = arith.mulf %35, %37 : vector<2x32xf32>
    %39 = vector.extract_strided_slice %10 {offsets = [0, 1, 0], sizes = [2, 1, 128], strides = [1, 1, 1]} : vector<2x8x128xf32> to vector<2x1x128xf32>
    %40 = vector.shape_cast %39 : vector<2x1x128xf32> to vector<2x128xf32>
    %cst_16 = arith.constant dense<0.000000e+00> : vector<2x128xf32>
    %41 = tpu.matmul %38, %23, %cst_16 {dimension_numbers = #tpu.dot_dimension_numbers<[1], [0], [0], [1], [0, 0, 1, 1], [], []>} : vector<2x32xf32>, vector<32x128xf32>, vector<2x128xf32> -> vector<2x128xf32>
    %42 = arith.addf %40, %41 : vector<2x128xf32>
    %43 = vector.broadcast %19 : vector<1x128xf32> to vector<2x128xf32>
    %44 = arith.mulf %42, %43 : vector<2x128xf32>
    %45 = math.tanh %44 : vector<2x128xf32>
    %46 = vector.broadcast %19 : vector<1x128xf32> to vector<2x128xf32>
    %47 = arith.mulf %45, %46 : vector<2x128xf32>
    %48 = vector.broadcast %22 : vector<1x128xf32> to vector<2x128xf32>
    %49 = arith.addf %47, %48 : vector<2x128xf32>
    %50 = vector.extract_strided_slice %49 {offsets = [0, 0], sizes = [2, 32], strides = [1, 1]} : vector<2x128xf32> to vector<2x32xf32>
    %51 = vector.extract_strided_slice %49 {offsets = [0, 32], sizes = [2, 32], strides = [1, 1]} : vector<2x128xf32> to vector<2x32xf32>
    %52 = vector.extract_strided_slice %49 {offsets = [0, 64], sizes = [2, 32], strides = [1, 1]} : vector<2x128xf32> to vector<2x32xf32>
    %53 = vector.extract_strided_slice %49 {offsets = [0, 96], sizes = [2, 32], strides = [1, 1]} : vector<2x128xf32> to vector<2x32xf32>
    %54 = arith.mulf %51, %36 : vector<2x32xf32>
    %55 = arith.mulf %50, %52 : vector<2x32xf32>
    %56 = arith.addf %54, %55 : vector<2x32xf32>
    %57 = math.tanh %56 : vector<2x32xf32>
    %58 = arith.mulf %53, %57 : vector<2x32xf32>
    %59 = vector.extract_strided_slice %10 {offsets = [0, 2, 0], sizes = [2, 1, 128], strides = [1, 1, 1]} : vector<2x8x128xf32> to vector<2x1x128xf32>
    %60 = vector.shape_cast %59 : vector<2x1x128xf32> to vector<2x128xf32>
    %cst_17 = arith.constant dense<0.000000e+00> : vector<2x128xf32>
    %61 = tpu.matmul %58, %23, %cst_17 {dimension_numbers = #tpu.dot_dimension_numbers<[1], [0], [0], [1], [0, 0, 1, 1], [], []>} : vector<2x32xf32>, vector<32x128xf32>, vector<2x128xf32> -> vector<2x128xf32>
    %62 = arith.addf %60, %61 : vector<2x128xf32>
    %63 = vector.broadcast %19 : vector<1x128xf32> to vector<2x128xf32>
    %64 = arith.mulf %62, %63 : vector<2x128xf32>
    %65 = math.tanh %64 : vector<2x128xf32>
    %66 = vector.broadcast %19 : vector<1x128xf32> to vector<2x128xf32>
    %67 = arith.mulf %65, %66 : vector<2x128xf32>
    %68 = vector.broadcast %22 : vector<1x128xf32> to vector<2x128xf32>
    %69 = arith.addf %67, %68 : vector<2x128xf32>
    %70 = vector.extract_strided_slice %69 {offsets = [0, 0], sizes = [2, 32], strides = [1, 1]} : vector<2x128xf32> to vector<2x32xf32>
    %71 = vector.extract_strided_slice %69 {offsets = [0, 32], sizes = [2, 32], strides = [1, 1]} : vector<2x128xf32> to vector<2x32xf32>
    %72 = vector.extract_strided_slice %69 {offsets = [0, 64], sizes = [2, 32], strides = [1, 1]} : vector<2x128xf32> to vector<2x32xf32>
    %73 = vector.extract_strided_slice %69 {offsets = [0, 96], sizes = [2, 32], strides = [1, 1]} : vector<2x128xf32> to vector<2x32xf32>
    %74 = arith.mulf %71, %56 : vector<2x32xf32>
    %75 = arith.mulf %70, %72 : vector<2x32xf32>
    %76 = arith.addf %74, %75 : vector<2x32xf32>
    %77 = math.tanh %76 : vector<2x32xf32>
    %78 = arith.mulf %73, %77 : vector<2x32xf32>
    %79 = vector.extract_strided_slice %10 {offsets = [0, 3, 0], sizes = [2, 1, 128], strides = [1, 1, 1]} : vector<2x8x128xf32> to vector<2x1x128xf32>
    %80 = vector.shape_cast %79 : vector<2x1x128xf32> to vector<2x128xf32>
    %cst_18 = arith.constant dense<0.000000e+00> : vector<2x128xf32>
    %81 = tpu.matmul %78, %23, %cst_18 {dimension_numbers = #tpu.dot_dimension_numbers<[1], [0], [0], [1], [0, 0, 1, 1], [], []>} : vector<2x32xf32>, vector<32x128xf32>, vector<2x128xf32> -> vector<2x128xf32>
    %82 = arith.addf %80, %81 : vector<2x128xf32>
    %83 = vector.broadcast %19 : vector<1x128xf32> to vector<2x128xf32>
    %84 = arith.mulf %82, %83 : vector<2x128xf32>
    %85 = math.tanh %84 : vector<2x128xf32>
    %86 = vector.broadcast %19 : vector<1x128xf32> to vector<2x128xf32>
    %87 = arith.mulf %85, %86 : vector<2x128xf32>
    %88 = vector.broadcast %22 : vector<1x128xf32> to vector<2x128xf32>
    %89 = arith.addf %87, %88 : vector<2x128xf32>
    %90 = vector.extract_strided_slice %89 {offsets = [0, 0], sizes = [2, 32], strides = [1, 1]} : vector<2x128xf32> to vector<2x32xf32>
    %91 = vector.extract_strided_slice %89 {offsets = [0, 32], sizes = [2, 32], strides = [1, 1]} : vector<2x128xf32> to vector<2x32xf32>
    %92 = vector.extract_strided_slice %89 {offsets = [0, 64], sizes = [2, 32], strides = [1, 1]} : vector<2x128xf32> to vector<2x32xf32>
    %93 = vector.extract_strided_slice %89 {offsets = [0, 96], sizes = [2, 32], strides = [1, 1]} : vector<2x128xf32> to vector<2x32xf32>
    %94 = arith.mulf %91, %76 : vector<2x32xf32>
    %95 = arith.mulf %90, %92 : vector<2x32xf32>
    %96 = arith.addf %94, %95 : vector<2x32xf32>
    %97 = math.tanh %96 : vector<2x32xf32>
    %98 = arith.mulf %93, %97 : vector<2x32xf32>
    %99 = vector.extract_strided_slice %10 {offsets = [0, 4, 0], sizes = [2, 1, 128], strides = [1, 1, 1]} : vector<2x8x128xf32> to vector<2x1x128xf32>
    %100 = vector.shape_cast %99 : vector<2x1x128xf32> to vector<2x128xf32>
    %cst_19 = arith.constant dense<0.000000e+00> : vector<2x128xf32>
    %101 = tpu.matmul %98, %23, %cst_19 {dimension_numbers = #tpu.dot_dimension_numbers<[1], [0], [0], [1], [0, 0, 1, 1], [], []>} : vector<2x32xf32>, vector<32x128xf32>, vector<2x128xf32> -> vector<2x128xf32>
    %102 = arith.addf %100, %101 : vector<2x128xf32>
    %103 = vector.broadcast %19 : vector<1x128xf32> to vector<2x128xf32>
    %104 = arith.mulf %102, %103 : vector<2x128xf32>
    %105 = math.tanh %104 : vector<2x128xf32>
    %106 = vector.broadcast %19 : vector<1x128xf32> to vector<2x128xf32>
    %107 = arith.mulf %105, %106 : vector<2x128xf32>
    %108 = vector.broadcast %22 : vector<1x128xf32> to vector<2x128xf32>
    %109 = arith.addf %107, %108 : vector<2x128xf32>
    %110 = vector.extract_strided_slice %109 {offsets = [0, 0], sizes = [2, 32], strides = [1, 1]} : vector<2x128xf32> to vector<2x32xf32>
    %111 = vector.extract_strided_slice %109 {offsets = [0, 32], sizes = [2, 32], strides = [1, 1]} : vector<2x128xf32> to vector<2x32xf32>
    %112 = vector.extract_strided_slice %109 {offsets = [0, 64], sizes = [2, 32], strides = [1, 1]} : vector<2x128xf32> to vector<2x32xf32>
    %113 = vector.extract_strided_slice %109 {offsets = [0, 96], sizes = [2, 32], strides = [1, 1]} : vector<2x128xf32> to vector<2x32xf32>
    %114 = arith.mulf %111, %96 : vector<2x32xf32>
    %115 = arith.mulf %110, %112 : vector<2x32xf32>
    %116 = arith.addf %114, %115 : vector<2x32xf32>
    %117 = math.tanh %116 : vector<2x32xf32>
    %118 = arith.mulf %113, %117 : vector<2x32xf32>
    %119 = vector.extract_strided_slice %10 {offsets = [0, 5, 0], sizes = [2, 1, 128], strides = [1, 1, 1]} : vector<2x8x128xf32> to vector<2x1x128xf32>
    %120 = vector.shape_cast %119 : vector<2x1x128xf32> to vector<2x128xf32>
    %cst_20 = arith.constant dense<0.000000e+00> : vector<2x128xf32>
    %121 = tpu.matmul %118, %23, %cst_20 {dimension_numbers = #tpu.dot_dimension_numbers<[1], [0], [0], [1], [0, 0, 1, 1], [], []>} : vector<2x32xf32>, vector<32x128xf32>, vector<2x128xf32> -> vector<2x128xf32>
    %122 = arith.addf %120, %121 : vector<2x128xf32>
    %123 = vector.broadcast %19 : vector<1x128xf32> to vector<2x128xf32>
    %124 = arith.mulf %122, %123 : vector<2x128xf32>
    %125 = math.tanh %124 : vector<2x128xf32>
    %126 = vector.broadcast %19 : vector<1x128xf32> to vector<2x128xf32>
    %127 = arith.mulf %125, %126 : vector<2x128xf32>
    %128 = vector.broadcast %22 : vector<1x128xf32> to vector<2x128xf32>
    %129 = arith.addf %127, %128 : vector<2x128xf32>
    %130 = vector.extract_strided_slice %129 {offsets = [0, 0], sizes = [2, 32], strides = [1, 1]} : vector<2x128xf32> to vector<2x32xf32>
    %131 = vector.extract_strided_slice %129 {offsets = [0, 32], sizes = [2, 32], strides = [1, 1]} : vector<2x128xf32> to vector<2x32xf32>
    %132 = vector.extract_strided_slice %129 {offsets = [0, 64], sizes = [2, 32], strides = [1, 1]} : vector<2x128xf32> to vector<2x32xf32>
    %133 = vector.extract_strided_slice %129 {offsets = [0, 96], sizes = [2, 32], strides = [1, 1]} : vector<2x128xf32> to vector<2x32xf32>
    %134 = arith.mulf %131, %116 : vector<2x32xf32>
    %135 = arith.mulf %130, %132 : vector<2x32xf32>
    %136 = arith.addf %134, %135 : vector<2x32xf32>
    %137 = math.tanh %136 : vector<2x32xf32>
    %138 = arith.mulf %133, %137 : vector<2x32xf32>
    %139 = vector.extract_strided_slice %10 {offsets = [0, 6, 0], sizes = [2, 1, 128], strides = [1, 1, 1]} : vector<2x8x128xf32> to vector<2x1x128xf32>
    %140 = vector.shape_cast %139 : vector<2x1x128xf32> to vector<2x128xf32>
    %cst_21 = arith.constant dense<0.000000e+00> : vector<2x128xf32>
    %141 = tpu.matmul %138, %23, %cst_21 {dimension_numbers = #tpu.dot_dimension_numbers<[1], [0], [0], [1], [0, 0, 1, 1], [], []>} : vector<2x32xf32>, vector<32x128xf32>, vector<2x128xf32> -> vector<2x128xf32>
    %142 = arith.addf %140, %141 : vector<2x128xf32>
    %143 = vector.broadcast %19 : vector<1x128xf32> to vector<2x128xf32>
    %144 = arith.mulf %142, %143 : vector<2x128xf32>
    %145 = math.tanh %144 : vector<2x128xf32>
    %146 = vector.broadcast %19 : vector<1x128xf32> to vector<2x128xf32>
    %147 = arith.mulf %145, %146 : vector<2x128xf32>
    %148 = vector.broadcast %22 : vector<1x128xf32> to vector<2x128xf32>
    %149 = arith.addf %147, %148 : vector<2x128xf32>
    %150 = vector.extract_strided_slice %149 {offsets = [0, 0], sizes = [2, 32], strides = [1, 1]} : vector<2x128xf32> to vector<2x32xf32>
    %151 = vector.extract_strided_slice %149 {offsets = [0, 32], sizes = [2, 32], strides = [1, 1]} : vector<2x128xf32> to vector<2x32xf32>
    %152 = vector.extract_strided_slice %149 {offsets = [0, 64], sizes = [2, 32], strides = [1, 1]} : vector<2x128xf32> to vector<2x32xf32>
    %153 = vector.extract_strided_slice %149 {offsets = [0, 96], sizes = [2, 32], strides = [1, 1]} : vector<2x128xf32> to vector<2x32xf32>
    %154 = arith.mulf %151, %136 : vector<2x32xf32>
    %155 = arith.mulf %150, %152 : vector<2x32xf32>
    %156 = arith.addf %154, %155 : vector<2x32xf32>
    %157 = math.tanh %156 : vector<2x32xf32>
    %158 = arith.mulf %153, %157 : vector<2x32xf32>
    %159 = vector.extract_strided_slice %10 {offsets = [0, 7, 0], sizes = [2, 1, 128], strides = [1, 1, 1]} : vector<2x8x128xf32> to vector<2x1x128xf32>
    %160 = vector.shape_cast %159 : vector<2x1x128xf32> to vector<2x128xf32>
    %cst_22 = arith.constant dense<0.000000e+00> : vector<2x128xf32>
    %161 = tpu.matmul %158, %23, %cst_22 {dimension_numbers = #tpu.dot_dimension_numbers<[1], [0], [0], [1], [0, 0, 1, 1], [], []>} : vector<2x32xf32>, vector<32x128xf32>, vector<2x128xf32> -> vector<2x128xf32>
    %162 = arith.addf %160, %161 : vector<2x128xf32>
    %163 = vector.broadcast %19 : vector<1x128xf32> to vector<2x128xf32>
    %164 = arith.mulf %162, %163 : vector<2x128xf32>
    %165 = math.tanh %164 : vector<2x128xf32>
    %166 = vector.broadcast %19 : vector<1x128xf32> to vector<2x128xf32>
    %167 = arith.mulf %165, %166 : vector<2x128xf32>
    %168 = vector.broadcast %22 : vector<1x128xf32> to vector<2x128xf32>
    %169 = arith.addf %167, %168 : vector<2x128xf32>
    %170 = vector.extract_strided_slice %169 {offsets = [0, 0], sizes = [2, 32], strides = [1, 1]} : vector<2x128xf32> to vector<2x32xf32>
    %171 = vector.extract_strided_slice %169 {offsets = [0, 32], sizes = [2, 32], strides = [1, 1]} : vector<2x128xf32> to vector<2x32xf32>
    %172 = vector.extract_strided_slice %169 {offsets = [0, 64], sizes = [2, 32], strides = [1, 1]} : vector<2x128xf32> to vector<2x32xf32>
    %173 = vector.extract_strided_slice %169 {offsets = [0, 96], sizes = [2, 32], strides = [1, 1]} : vector<2x128xf32> to vector<2x32xf32>
    %174 = arith.mulf %171, %156 : vector<2x32xf32>
    %175 = arith.mulf %170, %172 : vector<2x32xf32>
    %176 = arith.addf %174, %175 : vector<2x32xf32>
    %177 = math.tanh %176 : vector<2x32xf32>
    %178 = arith.mulf %173, %177 : vector<2x32xf32>
    %c0_23 = arith.constant 0 : index
    %c0_24 = arith.constant 0 : index
    %179 = vector.load %arg0[%c0_23, %c0_24] : memref<2x4xf32, #tpu.memory_space<vmem>>, vector<2x4xf32>
    %c0_25 = arith.constant 0 : index
    %c0_26 = arith.constant 0 : index
    %180 = vector.load %arg8[%c0_25, %c0_26] : memref<4x32xf32, #tpu.memory_space<vmem>>, vector<4x32xf32>
    %cst_27 = arith.constant dense<0.000000e+00> : vector<2x32xf32>
    %181 = tpu.matmul %179, %180, %cst_27 {dimension_numbers = #tpu.dot_dimension_numbers<[1], [0], [0], [1], [0, 0, 1, 1], [], []>} : vector<2x4xf32>, vector<4x32xf32>, vector<2x32xf32> -> vector<2x32xf32>
    %c0_28 = arith.constant 0 : index
    %c0_29 = arith.constant 0 : index
    %182 = vector.load %arg9[%c0_28, %c0_29] : memref<32x32xf32, #tpu.memory_space<vmem>>, vector<32x32xf32>
    %cst_30 = arith.constant dense<0.000000e+00> : vector<2x32xf32>
    %183 = tpu.matmul %178, %182, %cst_30 {dimension_numbers = #tpu.dot_dimension_numbers<[1], [0], [0], [1], [0, 0, 1, 1], [], []>} : vector<2x32xf32>, vector<32x32xf32>, vector<2x32xf32> -> vector<2x32xf32>
    %184 = arith.addf %181, %183 : vector<2x32xf32>
    %c0_31 = arith.constant 0 : index
    %c0_32 = arith.constant 0 : index
    %185 = vector.load %arg10[%c0_31, %c0_32] : memref<1x32xf32, #tpu.memory_space<vmem>>, vector<1x32xf32>
    %186 = vector.broadcast %185 : vector<1x32xf32> to vector<2x32xf32>
    %187 = arith.addf %184, %186 : vector<2x32xf32>
    %cst_33 = arith.constant 0.000000e+00 : f32
    %188 = vector.broadcast %cst_33 : f32 to vector<2x32xf32>
    %189 = arith.cmpf ogt, %187, %188 : vector<2x32xf32>
    %cst_34 = arith.constant 0.000000e+00 : f32
    %190 = vector.broadcast %cst_34 : f32 to vector<2x32xf32>
    %191 = arith.minimumf %187, %190 : vector<2x32xf32>
    %192 = math.exp %191 : vector<2x32xf32>
    %cst_35 = arith.constant 1.000000e+00 : f32
    %193 = vector.broadcast %cst_35 : f32 to vector<2x32xf32>
    %194 = arith.subf %192, %193 : vector<2x32xf32>
    %195 = arith.select %189, %187, %194 : vector<2x32xi1>, vector<2x32xf32>
    %c0_36 = arith.constant 0 : index
    %c0_37 = arith.constant 0 : index
    %196 = vector.load %arg11[%c0_36, %c0_37] : memref<32x16xf32, #tpu.memory_space<vmem>>, vector<32x16xf32>
    %cst_38 = arith.constant dense<0.000000e+00> : vector<2x16xf32>
    %197 = tpu.matmul %195, %196, %cst_38 {dimension_numbers = #tpu.dot_dimension_numbers<[1], [0], [0], [1], [0, 0, 1, 1], [], []>} : vector<2x32xf32>, vector<32x16xf32>, vector<2x16xf32> -> vector<2x16xf32>
    %c0_39 = arith.constant 0 : index
    %c0_40 = arith.constant 0 : index
    %198 = vector.load %arg12[%c0_39, %c0_40] : memref<1x16xf32, #tpu.memory_space<vmem>>, vector<1x16xf32>
    %199 = vector.broadcast %198 : vector<1x16xf32> to vector<2x16xf32>
    %200 = arith.addf %197, %199 : vector<2x16xf32>
    %cst_41 = arith.constant 0.000000e+00 : f32
    %201 = vector.broadcast %cst_41 : f32 to vector<2x16xf32>
    %202 = arith.cmpf ogt, %200, %201 : vector<2x16xf32>
    %cst_42 = arith.constant 0.000000e+00 : f32
    %203 = vector.broadcast %cst_42 : f32 to vector<2x16xf32>
    %204 = arith.minimumf %200, %203 : vector<2x16xf32>
    %205 = math.exp %204 : vector<2x16xf32>
    %cst_43 = arith.constant 1.000000e+00 : f32
    %206 = vector.broadcast %cst_43 : f32 to vector<2x16xf32>
    %207 = arith.subf %205, %206 : vector<2x16xf32>
    %208 = arith.select %202, %200, %207 : vector<2x16xi1>, vector<2x16xf32>
    %c0_44 = arith.constant 0 : index
    %c0_45 = arith.constant 0 : index
    %209 = vector.load %arg13[%c0_44, %c0_45] : memref<32x288xf32, #tpu.memory_space<vmem>>, vector<32x288xf32>
    %cst_46 = arith.constant dense<0.000000e+00> : vector<2x288xf32>
    %210 = tpu.matmul %178, %209, %cst_46 {dimension_numbers = #tpu.dot_dimension_numbers<[1], [0], [0], [1], [0, 0, 1, 1], [], []>} : vector<2x32xf32>, vector<32x288xf32>, vector<2x288xf32> -> vector<2x288xf32>
    %c0_47 = arith.constant 0 : index
    %c0_48 = arith.constant 0 : index
    %211 = vector.load %arg14[%c0_47, %c0_48] : memref<1x288xf32, #tpu.memory_space<vmem>>, vector<1x288xf32>
    %212 = vector.broadcast %211 : vector<1x288xf32> to vector<2x288xf32>
    %213 = arith.addf %210, %212 : vector<2x288xf32>
    %214 = vector.extract_strided_slice %213 {offsets = [0, 0], sizes = [2, 256], strides = [1, 1]} : vector<2x288xf32> to vector<2x256xf32>
    %215 = vector.extract_strided_slice %213 {offsets = [0, 256], sizes = [2, 32], strides = [1, 1]} : vector<2x288xf32> to vector<2x32xf32>
    %c0_49 = arith.constant 0 : index
    %c0_50 = arith.constant 0 : index
    %216 = vector.load %arg1[%c0_49, %c0_50] : memref<2x2xf32, #tpu.memory_space<vmem>>, vector<2x2xf32>
    %c0_51 = arith.constant 0 : index
    %c0_52 = arith.constant 0 : index
    %217 = vector.load %arg17[%c0_51, %c0_52] : memref<16x256xf32, #tpu.memory_space<vmem>>, vector<16x256xf32>
    %cst_53 = arith.constant dense<0.000000e+00> : vector<2x256xf32>
    %218 = tpu.matmul %208, %217, %cst_53 {dimension_numbers = #tpu.dot_dimension_numbers<[1], [0], [0], [1], [0, 0, 1, 1], [], []>} : vector<2x16xf32>, vector<16x256xf32>, vector<2x256xf32> -> vector<2x256xf32>
    %c0_54 = arith.constant 0 : index
    %c0_55 = arith.constant 0 : index
    %219 = vector.load %arg19[%c0_54, %c0_55] : memref<2x32xf32, #tpu.memory_space<vmem>>, vector<2x32xf32>
    %cst_56 = arith.constant dense<0.000000e+00> : vector<2x32xf32>
    %220 = tpu.matmul %216, %219, %cst_56 {dimension_numbers = #tpu.dot_dimension_numbers<[1], [0], [0], [1], [0, 0, 1, 1], [], []>} : vector<2x2xf32>, vector<2x32xf32>, vector<2x32xf32> -> vector<2x32xf32>
    %221 = arith.mulf %214, %218 : vector<2x256xf32>
    %c0_57 = arith.constant 0 : index
    %c0_58 = arith.constant 0 : index
    %222 = vector.load %arg18[%c0_57, %c0_58] : memref<256x16xf32, #tpu.memory_space<vmem>>, vector<256x16xf32>
    %cst_59 = arith.constant dense<0.000000e+00> : vector<2x16xf32>
    %223 = tpu.matmul %221, %222, %cst_59 {dimension_numbers = #tpu.dot_dimension_numbers<[1], [0], [0], [1], [0, 0, 1, 1], [], []>} : vector<2x256xf32>, vector<256x16xf32>, vector<2x16xf32> -> vector<2x16xf32>
    %224 = arith.mulf %215, %220 : vector<2x32xf32>
    %c0_60 = arith.constant 0 : index
    %c0_61 = arith.constant 0 : index
    %225 = vector.load %arg20[%c0_60, %c0_61] : memref<32x16xf32, #tpu.memory_space<vmem>>, vector<32x16xf32>
    %cst_62 = arith.constant dense<0.000000e+00> : vector<2x16xf32>
    %226 = tpu.matmul %224, %225, %cst_62 {dimension_numbers = #tpu.dot_dimension_numbers<[1], [0], [0], [1], [0, 0, 1, 1], [], []>} : vector<2x32xf32>, vector<32x16xf32>, vector<2x16xf32> -> vector<2x16xf32>
    %227 = arith.addf %223, %226 : vector<2x16xf32>
    %c0_63 = arith.constant 0 : index
    %c0_64 = arith.constant 0 : index
    %228 = vector.load %arg15[%c0_63, %c0_64] : memref<16x4xf32, #tpu.memory_space<vmem>>, vector<16x4xf32>
    %cst_65 = arith.constant dense<0.000000e+00> : vector<2x4xf32>
    %229 = tpu.matmul %227, %228, %cst_65 {dimension_numbers = #tpu.dot_dimension_numbers<[1], [0], [0], [1], [0, 0, 1, 1], [], []>} : vector<2x16xf32>, vector<16x4xf32>, vector<2x4xf32> -> vector<2x4xf32>
    %c0_66 = arith.constant 0 : index
    %c0_67 = arith.constant 0 : index
    %230 = vector.load %arg16[%c0_66, %c0_67] : memref<1x4xf32, #tpu.memory_space<vmem>>, vector<1x4xf32>
    %231 = vector.broadcast %230 : vector<1x4xf32> to vector<2x4xf32>
    %232 = arith.addf %229, %231 : vector<2x4xf32>
    %cst_68 = arith.constant 0.000000e+00 : f32
    %233 = vector.broadcast %cst_68 : f32 to vector<2x128xf32>
    %c0_69 = arith.constant 0 : index
    %c0_70 = arith.constant 0 : index
    %234 = vector.load %arg21[%c0_69, %c0_70] : memref<2x128xf32, #tpu.memory_space<vmem>>, vector<2x128xf32>
    tpu.vector_store %arg21[%c0_69, %c0_70], %233 {strides = array<i32>} : memref<2x128xf32, #tpu.memory_space<vmem>>, vector<2x128xf32>,
    %c0_71 = arith.constant 0 : index
    %c0_72 = arith.constant 0 : index
    %235 = vector.load %arg21[%c0_71, %c0_72] : memref<2x128xf32, #tpu.memory_space<vmem>>, vector<2x16xf32>
    tpu.vector_store %arg21[%c0_71, %c0_72], %208 {strides = array<i32>} : memref<2x128xf32, #tpu.memory_space<vmem>>, vector<2x16xf32>,
    %c0_73 = arith.constant 0 : index
    %c16 = arith.constant 16 : index
    %236 = vector.load %arg21[%c0_73, %c16] : memref<2x128xf32, #tpu.memory_space<vmem>>, vector<2x16xf32>
    tpu.vector_store %arg21[%c0_73, %c16], %227 {strides = array<i32>} : memref<2x128xf32, #tpu.memory_space<vmem>>, vector<2x16xf32>,
    %c0_74 = arith.constant 0 : index
    %c32 = arith.constant 32 : index
    %237 = vector.load %arg21[%c0_74, %c32] : memref<2x128xf32, #tpu.memory_space<vmem>>, vector<2x4xf32>
    tpu.vector_store %arg21[%c0_74, %c32], %232 {strides = array<i32>} : memref<2x128xf32, #tpu.memory_space<vmem>>, vector<2x4xf32>,
    return
  }
}

</mosaic_0001>

<bundles_post_ra>
// kernel: lko_forward.1
= control target key start
LH: loop header
LB: loop body
LE: loop exit
PB: predicated region body
PF: predicated region fallthrough
CT: control target
= control target key end

     0   :  { %s3786_s0 = inlined_call_operand.hbm [shape: f32[2,4], index: 0, kind: input, shape index: {}]   ;;  %s3787_s1 = inlined_call_operand.hbm [shape: f32[2,2], index: 1, kind: input, shape index: {}]   ;;  %s3788_s2 = inlined_call_operand.vmem [shape: f32[16,4], index: 2, kind: input, shape index: {}]   ;;  %s3789_s3 = inlined_call_operand.vmem [shape: f32[16,2], index: 3, kind: input, shape index: {}]   ;;  %s3790_s4 = inlined_call_operand.hbm [shape: f32[4,128], index: 4, kind: input, shape index: {}]   ;;  %s3791_s5 = inlined_call_operand.hbm [shape: f32[2,128], index: 5, kind: input, shape index: {}]   ;;  %s3792_s6 = inlined_call_operand.hbm [shape: f32[1,128], index: 6, kind: input, shape index: {}]   ;;  %s3793_s7 = inlined_call_operand.hbm [shape: f32[32,128], index: 7, kind: input, shape index: {}]   ;;  %s3794_s8 = inlined_call_operand.vmem [shape: f32[4,32], index: 8, kind: input, shape index: {}]   ;;  %s3795_s9 = inlined_call_operand.hbm [shape: f32[32,32], index: 9, kind: input, shape index: {}]   ;;  %s3796_s10 = inlined_call_operand.hbm [shape: f32[1,32], index: 10, kind: input, shape index: {}]   ;;  %s3797_s11 = inlined_call_operand.hbm [shape: f32[32,16], index: 11, kind: input, shape index: {}]   ;;  %s3798_s12 = inlined_call_operand.hbm [shape: f32[1,16], index: 12, kind: input, shape index: {}]   ;;  %s3799_s13 = inlined_call_operand.vmem [shape: f32[32,288], index: 13, kind: input, shape index: {}]   ;;  %s3800_s14 = inlined_call_operand.vmem [shape: f32[1,288], index: 14, kind: input, shape index: {}]   ;;  %s3801_s15 = inlined_call_operand.hbm [shape: f32[16,4], index: 15, kind: input, shape index: {}]   ;;  %s3802_s16 = inlined_call_operand.vmem [shape: f32[1,4], index: 16, kind: input, shape index: {}]   ;;  %s3803_s17 = inlined_call_operand.hbm [shape: f32[16,256], index: 17, kind: input, shape index: {}]   ;;  %s3804_s18 = inlined_call_operand.hbm [shape: f32[256,16], index: 18, kind: input, shape index: {}]   ;;  %s3805_s19 = inlined_call_operand.vmem [shape: f32[2,32], index: 19, kind: input, shape index: {}]   ;;  %s3806_s20 = inlined_call_operand.hbm [shape: f32[32,16], index: 20, kind: input, shape index: {}]   ;;  %s3807_s21 = inlined_call_operand.vmem [shape: f32[2,128], index: 21, kind: output, shape index: {}]  }
   0x1   :  { %3814 = sst [smem:[#allocation32_spill]] %s3786_s0 }
   0x2   :  { %3815 = sst [smem:[#allocation33_spill]] %s3787_s1 }
   0x3   :  { %3816 = sst [smem:[#allocation34_spill]] %s3788_s2 }
   0x4   :  { %3817 = sst [smem:[#allocation35_spill]] %s3789_s3 }
   0x5   :  { %3818 = sst [smem:[#allocation36_spill]] %s3790_s4 }
   0x6   :  { %3819 = sst [smem:[#allocation37_spill]] %s3791_s5 }
   0x7   :  { %3820 = sst [smem:[#allocation38_spill]] %s3802_s16 }
   0x8   :  { %26 = vsyncpa [#allocation3], 0 }
   0x9   :  { %27 = vsyncpa [#allocation5], 0 }
   0xa   :  { %28 = vsyncpa [#allocation8], 0 }
   0xb   :  { %29 = vsyncpa [#allocation11], 0 }
   0xc   :  { %30 = vsyncpa [#allocation14], 0 }
   0xd   :  { %31 = vsyncpa [#allocation17], 0 }
   0xe   :  { %32 = vsyncpa [#allocation20], 0 }
   0xf   :  { %33 = vsyncpa [#allocation23], 0  ;;  %s3108_s2 = smov [#allocation4]   ;;  %s3109_s26 = smov [#allocation7]  }
  0x10   :  { %s50_s25 = sshll.u32 %s3108_s2, 4  ;;  %s74_s27 = sshll.u32 %s3109_s26, 4  ;;  %s51_s25 = int_to_ptr.vmem [resolvable:$true] %s50_s25  ;;  %s75_s27 = int_to_ptr.vmem [resolvable:$true] %s74_s27 }
  0x11   :  { %s3821_s29 = sld [smem:[#allocation33_spill]] }
  0x17   :  { %s2784_s0 = scalar_lea.hbm %s3821_s29, 32 }
  0x18   :  { %p2785_p0 = scmp.ne.s32.totalorder %s3821_s29, %s2784_s0  ;;  %p2788_p1 = scmp.lt.u32.totalorder %s2784_s0, %s3821_s29 }
  0x1a   :  { %p2790_p2 = pnand %p2788_p1, %p2785_p0 }
  0x1c   :  { %2793 = shalt.err (!%p2790_p2)
}
  0x1d   :  { %s2794_s23 = scalar_lea.vmem %s51_s25, 32  ;;  %p2799_p4 = scmp.lt.s32.totalorder %s51_s25, %s51_s25 }
  0x1e   :  { %p2795_p3 = scmp.ne.s32.totalorder %s51_s25, %s2794_s23  ;;  %p2800_p5 = scmp.lt.s32.totalorder %s2794_s23, %s2794_s23 }
  0x20   :  { %p2801_p6 = por %p2800_p5, %p2799_p4 }
  0x22   :  { %p2802_p7 = pnand %p2801_p6, %p2795_p3 }
  0x24   :  { %2805 = shalt.err (!%p2802_p7)
}
  0x25   :  { %53 = dma.hbm_to_vmem [thread:$0]  %s3821_s29, 32, %s51_s25, [#allocation5]  }
  0x26   :  { %s3822_s3 = sld [smem:[#allocation37_spill]] }
  0x2c   :  { %s2806_s28 = scalar_lea.hbm %s3822_s3, 32 }
  0x2d   :  { %p2807_p8 = scmp.ne.s32.totalorder %s3822_s3, %s2806_s28  ;;  %p2810_p9 = scmp.lt.u32.totalorder %s2806_s28, %s3822_s3 }
  0x2f   :  { %p2812_p10 = pnand %p2810_p9, %p2807_p8 }
  0x31   :  { %2815 = shalt.err (!%p2812_p10)
}
  0x32   :  { %s2816_s22 = scalar_lea.vmem %s75_s27, 32  ;;  %p2821_p12 = scmp.lt.s32.totalorder %s75_s27, %s75_s27 }
  0x33   :  { %p2817_p11 = scmp.ne.s32.totalorder %s75_s27, %s2816_s22  ;;  %p2822_p13 = scmp.lt.s32.totalorder %s2816_s22, %s2816_s22 }
  0x35   :  { %p2823_p0 = por %p2822_p13, %p2821_p12 }
  0x37   :  { %p2824_p1 = pnand %p2823_p0, %p2817_p11 }
  0x39   :  { %2827 = shalt.err (!%p2824_p1)
}
  0x3a   :  { %77 = dma.hbm_to_vmem [thread:$0]  %s3822_s3, 32, %s75_s27, [#allocation8]  }
  0x3b   :  { %s3110_s23 = smov [#allocation10]   ;;  %s2828_s26 = scalar_lea.hbm %s3793_s7, 512 }
  0x3c   :  { %s93_s1 = sshll.u32 %s3110_s23, 4  ;;  %p2829_p2 = scmp.ne.s32.totalorder %s3793_s7, %s2828_s26  ;;  %s94_s1 = int_to_ptr.vmem [resolvable:$true] %s93_s1 }
  0x3d   :  { %p2832_p3 = scmp.lt.u32.totalorder %s2828_s26, %s3793_s7 }
  0x3f   :  { %p2834_p4 = pnand %p2832_p3, %p2829_p2 }
  0x41   :  { %2837 = shalt.err (!%p2834_p4)
}
  0x42   :  { %s2838_s5 = scalar_lea.vmem %s94_s1, 512  ;;  %p2843_p6 = scmp.lt.s32.totalorder %s94_s1, %s94_s1 }
  0x43   :  { %p2839_p5 = scmp.ne.s32.totalorder %s94_s1, %s2838_s5  ;;  %p2844_p7 = scmp.lt.s32.totalorder %s2838_s5, %s2838_s5 }
  0x45   :  { %p2845_p8 = por %p2844_p7, %p2843_p6 }
  0x47   :  { %p2846_p9 = pnand %p2845_p8, %p2839_p5 }
  0x49   :  { %2849 = shalt.err (!%p2846_p9)
}
  0x4a   :  { %s3111_s27 = smov 128   ;;  %s3112_s3 = smov 8  }
  0x4b   :  { %99 = dma.hbm_to_vmem [thread:$0]  %s3793_s7, 512, %s94_s1, [#allocation11], %s3111_s27, %s3111_s27, %s3112_s3  }
  0x4c   :  { %s3113_s29 = smov [#allocation13]   ;;  %s3114_s24 = smov [#allocation16]  }
  0x4d   :  { %s120_s23 = sshll.u32 %s3113_s29, 4  ;;  %s142_s2 = sshll.u32 %s3114_s24, 4  ;;  %s121_s23 = int_to_ptr.vmem [resolvable:$true] %s120_s23  ;;  %s143_s2 = int_to_ptr.vmem [resolvable:$true] %s142_s2 }
  0x4e   :  { %s2850_s4 = scalar_lea.hbm %s3796_s10, 16 }
  0x4f   :  { %p2851_p10 = scmp.ne.s32.totalorder %s3796_s10, %s2850_s4  ;;  %p2854_p11 = scmp.lt.u32.totalorder %s2850_s4, %s3796_s10 }
  0x51   :  { %p2856_p12 = pnand %p2854_p11, %p2851_p10 }
  0x53   :  { %2859 = shalt.err (!%p2856_p12)
}
  0x54   :  { %s2860_s7 = scalar_lea.vmem %s121_s23, 16  ;;  %s2864_s1 = scalar_lea.vmem %s121_s23, 32 }
  0x55   :  { %p2861_p13 = scmp.ne.s32.totalorder %s121_s23, %s2860_s7  ;;  %p2865_p0 = scmp.lt.s32.totalorder %s121_s23, %s121_s23 }
  0x56   :  { %p2866_p1 = scmp.lt.s32.totalorder %s2864_s1, %s2860_s7 }
  0x58   :  { %p2867_p2 = por %p2866_p1, %p2865_p0 }
  0x5a   :  { %p2868_p3 = pnand %p2867_p2, %p2861_p13 }
  0x5c   :  { %2871 = shalt.err (!%p2868_p3)
}
  0x5d   :  { %123 = dma.hbm_to_vmem [thread:$0]  %s3796_s10, 16, %s121_s23, [#allocation14]  }
  0x5e   :  { %s2872_s16 = scalar_lea.hbm %s3798_s12, 16 }
  0x5f   :  { %p2873_p4 = scmp.ne.s32.totalorder %s3798_s12, %s2872_s16  ;;  %p2876_p5 = scmp.lt.u32.totalorder %s2872_s16, %s3798_s12 }
  0x61   :  { %p2878_p6 = pnand %p2876_p5, %p2873_p4 }
  0x63   :  { %2881 = shalt.err (!%p2878_p6)
}
  0x64   :  { %s2882_s0 = scalar_lea.vmem %s143_s2, 16  ;;  %s2886_s5 = scalar_lea.vmem %s143_s2, 32 }
  0x65   :  { %p2883_p7 = scmp.ne.s32.totalorder %s143_s2, %s2882_s0  ;;  %p2887_p8 = scmp.lt.s32.totalorder %s143_s2, %s143_s2 }
  0x66   :  { %p2888_p9 = scmp.lt.s32.totalorder %s2886_s5, %s2882_s0 }
  0x68   :  { %p2889_p10 = por %p2888_p9, %p2887_p8 }
  0x6a   :  { %p2890_p11 = pnand %p2889_p10, %p2883_p7 }
  0x6c   :  { %2893 = shalt.err (!%p2890_p11)
}
  0x6d   :  { %145 = dma.hbm_to_vmem [thread:$0]  %s3798_s12, 16, %s143_s2, [#allocation17]  }
  0x6e   :  { %s3115_s7 = smov [#allocation19]   ;;  %s2894_s29 = scalar_lea.hbm %s3803_s17, 512 }
  0x6f   :  { %s169_s1 = sshll.u32 %s3115_s7, 4  ;;  %p2895_p12 = scmp.ne.s32.totalorder %s3803_s17, %s2894_s29  ;;  %s170_s1 = int_to_ptr.vmem [resolvable:$true] %s169_s1 }
  0x70   :  { %p2898_p13 = scmp.lt.u32.totalorder %s2894_s29, %s3803_s17 }
  0x72   :  { %p2900_p0 = pnand %p2898_p13, %p2895_p12 }
  0x74   :  { %2903 = shalt.err (!%p2900_p0)
}
  0x75   :  { %s2904_s4 = scalar_lea.vmem %s170_s1, 512  ;;  %p2909_p2 = scmp.lt.s32.totalorder %s170_s1, %s170_s1 }
  0x76   :  { %p2905_p1 = scmp.ne.s32.totalorder %s170_s1, %s2904_s4  ;;  %p2910_p3 = scmp.lt.s32.totalorder %s2904_s4, %s2904_s4 }
  0x78   :  { %p2911_p4 = por %p2910_p3, %p2909_p2 }
  0x7a   :  { %p2912_p5 = pnand %p2911_p4, %p2905_p1 }
  0x7c   :  { %2915 = shalt.err (!%p2912_p5)
}
  0x7d   :  { %s3116_s12 = smov 256   ;;  %s3117_s2 = smov 16  }
  0x7e   :  { %175 = dma.hbm_to_vmem [thread:$0]  %s3803_s17, 512, %s170_s1, [#allocation20], %s3116_s12, %s3116_s12, %s3117_s2  }
  0x7f   :  { %s3118_s5 = smov [#allocation2]   ;;  %s3119_s23 = smov [#allocation6]  }
  0x80   :  { %s40_s10 = sshll.u32 %s3118_s5, 4  ;;  %s64_s7 = sshll.u32 %s3119_s23, 4  ;;  %s41_s10 = int_to_ptr.vmem [resolvable:$true] %s40_s10  ;;  %s65_s7 = int_to_ptr.vmem [resolvable:$true] %s64_s7 }
  0x81   :  { %s3823_s29 = sld [smem:[#allocation32_spill]] }
  0x87   :  { %s2916_s24 = scalar_lea.hbm %s3823_s29, 32 }
  0x88   :  { %p2917_p6 = scmp.ne.s32.totalorder %s3823_s29, %s2916_s24  ;;  %p2920_p7 = scmp.lt.u32.totalorder %s2916_s24, %s3823_s29 }
  0x8a   :  { %p2922_p8 = pnand %p2920_p7, %p2917_p6 }
  0x8c   :  { %2925 = shalt.err (!%p2922_p8)
}
  0x8d   :  { %s2926_s17 = scalar_lea.vmem %s41_s10, 32  ;;  %p2931_p10 = scmp.lt.s32.totalorder %s41_s10, %s41_s10 }
  0x8e   :  { %p2927_p9 = scmp.ne.s32.totalorder %s41_s10, %s2926_s17  ;;  %p2932_p11 = scmp.lt.s32.totalorder %s2926_s17, %s2926_s17 }
  0x90   :  { %p2933_p12 = por %p2932_p11, %p2931_p10 }
  0x92   :  { %p2934_p13 = pnand %p2933_p12, %p2927_p9 }
  0x94   :  { %2937 = shalt.err (!%p2934_p13)
}
  0x95   :  { %43 = dma.hbm_to_vmem [thread:$0]  %s3823_s29, 32, %s41_s10, [#allocation3]  }
  0x96   :  { %s3824_s5 = sld [smem:[#allocation36_spill]] }
  0x9c   :  { %s2938_s23 = scalar_lea.hbm %s3824_s5, 64 }
  0x9d   :  { %p2939_p0 = scmp.ne.s32.totalorder %s3824_s5, %s2938_s23  ;;  %p2942_p1 = scmp.lt.u32.totalorder %s2938_s23, %s3824_s5 }
  0x9f   :  { %p2944_p2 = pnand %p2942_p1, %p2939_p0 }
  0xa1   :  { %2947 = shalt.err (!%p2944_p2)
}
  0xa2   :  { %s2948_s26 = scalar_lea.vmem %s65_s7, 64  ;;  %p2953_p4 = scmp.lt.s32.totalorder %s65_s7, %s65_s7 }
  0xa3   :  { %p2949_p3 = scmp.ne.s32.totalorder %s65_s7, %s2948_s26  ;;  %p2954_p5 = scmp.lt.s32.totalorder %s2948_s26, %s2948_s26 }
  0xa5   :  { %p2955_p6 = por %p2954_p5, %p2953_p4 }
  0xa7   :  { %p2956_p7 = pnand %p2955_p6, %p2949_p3 }
  0xa9   :  { %2959 = shalt.err (!%p2956_p7)
}
  0xaa   :  { %67 = dma.hbm_to_vmem [thread:$0]  %s3824_s5, 64, %s65_s7, [#allocation5]  }
  0xab   :  { %s3120_s28 = smov [#allocation9]   ;;  %s3121_s17 = smov [#allocation12]  }
  0xac   :  { %s84_s4 = sshll.u32 %s3120_s28, 4  ;;  %s107_s1 = sshll.u32 %s3121_s17, 4  ;;  %s85_s4 = int_to_ptr.vmem [resolvable:$true] %s84_s4  ;;  %s3343_s1 = int_to_ptr.vmem [resolvable:$true] %s107_s1 }
  0xad   :  { %s2960_s0 = scalar_lea.hbm %s3792_s6, 16 }
  0xae   :  { %p2961_p8 = scmp.ne.s32.totalorder %s3792_s6, %s2960_s0  ;;  %p2964_p9 = scmp.lt.u32.totalorder %s2960_s0, %s3792_s6 }
  0xb0   :  { %p2966_p10 = pnand %p2964_p9, %p2961_p8 }
  0xb2   :  { %2969 = shalt.err (!%p2966_p10)
}
  0xb3   :  { %s2970_s7 = scalar_lea.vmem %s85_s4, 16  ;;  %s2974_s5 = scalar_lea.vmem %s85_s4, 32 }
  0xb4   :  { %p2971_p11 = scmp.ne.s32.totalorder %s85_s4, %s2970_s7  ;;  %p2975_p12 = scmp.lt.s32.totalorder %s85_s4, %s85_s4 }
  0xb5   :  { %p2976_p13 = scmp.lt.s32.totalorder %s2974_s5, %s2970_s7 }
  0xb7   :  { %p2977_p0 = por %p2976_p13, %p2975_p12 }
  0xb9   :  { %p2978_p1 = pnand %p2977_p0, %p2971_p11 }
  0xbb   :  { %2981 = shalt.err (!%p2978_p1)
}
  0xbc   :  { %87 = dma.hbm_to_vmem [thread:$0]  %s3792_s6, 16, %s85_s4, [#allocation8]  }
  0xbd   :  { %s2982_s28 = scalar_lea.hbm %s3795_s9, 512 }
  0xbe   :  { %p2983_p2 = scmp.ne.s32.totalorder %s3795_s9, %s2982_s28  ;;  %p2986_p3 = scmp.lt.u32.totalorder %s2982_s28, %s3795_s9 }
  0xc0   :  { %p2988_p4 = pnand %p2986_p3, %p2983_p2 }
  0xc2   :  { %2991 = shalt.err (!%p2988_p4)
}
  0xc3   :  { %s2992_s23 = scalar_lea.vmem %s3343_s1, 512  ;;  %p2997_p6 = scmp.lt.s32.totalorder %s3343_s1, %s3343_s1 }
  0xc4   :  { %p2993_p5 = scmp.ne.s32.totalorder %s3343_s1, %s2992_s23  ;;  %p2998_p7 = scmp.lt.s32.totalorder %s2992_s23, %s2992_s23 }
  0xc6   :  { %p2999_p8 = por %p2998_p7, %p2997_p6 }
  0xc8   :  { %p3000_p9 = pnand %p2999_p8, %p2993_p5 }
  0xca   :  { %3003 = shalt.err (!%p3000_p9)
}
  0xcb   :  { %113 = dma.hbm_to_vmem [thread:$0]  %s3795_s9, 512, %s3343_s1, [#allocation11], %s3111_s27, %s3111_s27, %s3112_s3  }
  0xcc   :  { %s3122_s22 = smov [#allocation15]   ;;  %s3123_s24 = smov [#allocation18]  }
  0xcd   :  { %s129_s25 = sshll.u32 %s3122_s22, 4  ;;  %s155_s7 = sshll.u32 %s3123_s24, 4  ;;  %s130_s25 = int_to_ptr.vmem [resolvable:$true] %s129_s25  ;;  %s3377_s7 = int_to_ptr.vmem [resolvable:$true] %s155_s7 }
  0xce   :  { %s3004_s26 = scalar_lea.hbm %s3797_s11, 512 }
  0xcf   :  { %p3005_p10 = scmp.ne.s32.totalorder %s3797_s11, %s3004_s26  ;;  %p3008_p11 = scmp.lt.u32.totalorder %s3004_s26, %s3797_s11 }
  0xd1   :  { %p3010_p12 = pnand %p3008_p11, %p3005_p10 }
  0xd3   :  { %3013 = shalt.err (!%p3010_p12)
}
  0xd4   :  { %s3014_s9 = scalar_lea.vmem %s130_s25, 512  ;;  %p3019_p0 = scmp.lt.s32.totalorder %s130_s25, %s130_s25 }
  0xd5   :  { %p3015_p13 = scmp.ne.s32.totalorder %s130_s25, %s3014_s9  ;;  %p3020_p1 = scmp.lt.s32.totalorder %s3014_s9, %s3014_s9 }
  0xd7   :  { %p3021_p2 = por %p3020_p1, %p3019_p0 }
  0xd9   :  { %p3022_p3 = pnand %p3021_p2, %p3015_p13 }
  0xdb   :  { %3025 = shalt.err (!%p3022_p3)
}
  0xdc   :  { %135 = dma.hbm_to_vmem [thread:$0]  %s3797_s11, 512, %s130_s25, [#allocation14], %s3111_s27, %s3111_s27, %s3112_s3  }
  0xdd   :  { %s3026_s23 = scalar_lea.hbm %s3801_s15, 256 }
  0xde   :  { %p3027_p4 = scmp.ne.s32.totalorder %s3801_s15, %s3026_s23  ;;  %p3030_p5 = scmp.lt.u32.totalorder %s3026_s23, %s3801_s15 }
  0xe0   :  { %p3032_p6 = pnand %p3030_p5, %p3027_p4 }
  0xe2   :  { %3035 = shalt.err (!%p3032_p6)
}
  0xe3   :  { %s3036_s5 = scalar_lea.vmem %s3377_s7, 256  ;;  %p3041_p8 = scmp.lt.s32.totalorder %s3377_s7, %s3377_s7 }
  0xe4   :  { %p3037_p7 = scmp.ne.s32.totalorder %s3377_s7, %s3036_s5  ;;  %p3042_p9 = scmp.lt.s32.totalorder %s3036_s5, %s3036_s5 }
  0xe6   :  { %p3043_p10 = por %p3042_p9, %p3041_p8 }
  0xe8   :  { %p3044_p11 = pnand %p3043_p10, %p3037_p7 }
  0xea   :  { %3047 = shalt.err (!%p3044_p11)
}
  0xeb   :  { %161 = dma.hbm_to_vmem [thread:$0]  %s3801_s15, 256, %s3377_s7, [#allocation17], %s3111_s27, %s3111_s27, %s3112_s3  }
  0xec   :  { %s3124_s16 = smov [#allocation21]   ;;  %s3125_s10 = smov [#allocation22]  }
  0xed   :  { %s181_s26 = sshll.u32 %s3124_s16, 4  ;;  %s195_s29 = sshll.u32 %s3125_s10, 4  ;;  %s182_s26 = int_to_ptr.vmem [resolvable:$true] %s181_s26  ;;  %s3414_s29 = int_to_ptr.vmem [resolvable:$true] %s195_s29 }
  0xee   :  { %s3048_s9 = scalar_lea.hbm %s3804_s18, 4096 }
  0xef   :  { %p3049_p12 = scmp.ne.s32.totalorder %s3804_s18, %s3048_s9  ;;  %p3052_p13 = scmp.lt.u32.totalorder %s3048_s9, %s3804_s18 }
  0xf1   :  { %p3054_p0 = pnand %p3052_p13, %p3049_p12 }
  0xf3   :  { %3057 = shalt.err (!%p3054_p0)
}
  0xf4   :  { %s3058_s15 = scalar_lea.vmem %s182_s26, 4096  ;;  %p3063_p2 = scmp.lt.s32.totalorder %s182_s26, %s182_s26 }
  0xf5   :  { %p3059_p1 = scmp.ne.s32.totalorder %s182_s26, %s3058_s15  ;;  %p3064_p3 = scmp.lt.s32.totalorder %s3058_s15, %s3058_s15 }
  0xf7   :  { %p3065_p4 = por %p3064_p3, %p3063_p2 }
  0xf9   :  { %p3066_p5 = pnand %p3065_p4, %p3059_p1 }
  0xfb   :  { %3069 = shalt.err (!%p3066_p5)
}
  0xfc   :  { %187 = dma.hbm_to_vmem [thread:$0]  %s3804_s18, 4096, %s182_s26, [#allocation20], %s3111_s27, %s3111_s27, %s3112_s3  }
  0xfd   :  { %s3070_s22 = scalar_lea.hbm %s3806_s20, 512 }
  0xfe   :  { %p3071_p6 = scmp.ne.s32.totalorder %s3806_s20, %s3070_s22  ;;  %p3074_p7 = scmp.lt.u32.totalorder %s3070_s22, %s3806_s20 }
 0x100   :  { %p3076_p8 = pnand %p3074_p7, %p3071_p6 }
 0x102   :  { %3079 = shalt.err (!%p3076_p8)
}
 0x103   :  { %s3080_s16 = scalar_lea.vmem %s3414_s29, 512  ;;  %p3085_p10 = scmp.lt.s32.totalorder %s3414_s29, %s3414_s29 }
 0x104   :  { %p3081_p9 = scmp.ne.s32.totalorder %s3414_s29, %s3080_s16  ;;  %p3086_p11 = scmp.lt.s32.totalorder %s3080_s16, %s3080_s16 }
 0x106   :  { %p3087_p12 = por %p3086_p11, %p3085_p10 }
 0x108   :  { %p3088_p13 = pnand %p3087_p12, %p3081_p9 }
 0x10a   :  { %3091 = shalt.err (!%p3088_p13)
}
 0x10b   :  { %201 = dma.hbm_to_vmem [thread:$0]  %s3806_s20, 512, %s3414_s29, [#allocation23], %s3111_s27, %s3111_s27, %s3112_s3  }
 0x10c   :  { %3092 = dma.done.wait [#allocation3], 32  }
 0x10d   :  { %3093 = vsyncadd [#allocation3], 4294967264 }
 0x10e   :  { %3094 = dma.done.wait [#allocation5], 96  }
 0x10f   :  { %3095 = vsyncadd [#allocation5], 4294967200 }
 0x110   :  { %3096 = dma.done.wait [#allocation8], 48  }
 0x111   :  { %3097 = vsyncadd [#allocation8], 4294967248 }
 0x112   :  { %3098 = dma.done.wait [#allocation11], 1024  }
 0x113   :  { %3099 = vsyncadd [#allocation11], 4294966272 }
 0x114   :  { %3100 = dma.done.wait [#allocation14], 528  }
 0x115   :  { %3101 = vsyncadd [#allocation14], 4294966768 }
 0x116   :  { %3102 = dma.done.wait [#allocation17], 272  }
 0x117   :  { %3103 = vsyncadd [#allocation17], 4294967024 }
 0x118   :  { %3104 = dma.done.wait [#allocation20], 4608  }
 0x119   :  { %3105 = vsyncadd [#allocation20], 4294962688 }
 0x11a   :  { %3106 = dma.done.wait [#allocation23], 512  }
 0x11b   :  { %3107 = vsyncadd [#allocation23], 4294966784  ;;  %vm257_vm0 = vcmask 1041408   ;;  %vm343_vm1 = vcmask 1043456   ;;  %vm250_vm2 = vcmask 15360   ;;  %s3825_s3 = sld [smem:[#allocation35_spill]]  ;;  %v431_v6 = vlaneseq }
 0x11c   :  { %v249_v0 = vld [vmem:[#allocation7] sm:$0x3]  ;;  %v246_v1 = vld [vmem:[#allocation6] sm:$0xf]  ;;  %vm336_vm3 = vcmask 31744   ;;  %s3826_s28 = sld [smem:[#allocation34_spill]] }
 0x11d   :  { %2428 = vmatprep.subr.msk.mxu1 %vm257_vm0, %v249_v0  ;;  %2433 = vmatprep.subr.msk.mxu0 %vm343_vm1, %v246_v1  ;;  %v432_v7 = vand.u32 127, %v431_v6  ;;  %v2301_v11 = vld [vmem:[#allocation9] ss:$0 sm:$0xff]  ;;  %v3126_v16 = vmov 0.5   ;;  %s3127_s30 = smov 64   ;;  %v438_v33 = vld [vmem:[#allocation10] sm:$0xff] }
 0x11e   :  { %2429 = vmatpush3.msk.msra.mxu1 %vm257_vm0, %v249_v0  ;;  %2434 = vmatpush3.msk.msra.mxu0 %vm343_vm1, %v246_v1  ;;  %v439_v34 = vld [vmem:[#allocation10 + $0x8] sm:$0xff]  ;;  %v440_v35 = vld [vmem:[#allocation10 + $0x10] sm:$0xff]  ;;  %v3128_v36 = vmov 0.0|0.0   ;;  %v441_v38 = vld [vmem:[#allocation10 + $0x18] sm:$0xff]  ;;  %vm3129_vm7 = vmmov 0   ;;  %v3130_v39 = vmov 0.0  }
 0x11f   :  { %vm433_vm4 = vcmp.ge.s32.totalorder %v432_v7, 64  ;;  %vm434_vm5 = vcmp.lt.s32.totalorder %v432_v7, 96  ;;  %2576 = vmatprep.subr.bf16.mxu1 %v3128_v36  ;;  %v3505_v37 = vpack.c.bf16 %v439_v34, %v438_v33  ;;  %2269 = vst [vmem:[%s3807_s21] sm:$0x3] %v3130_v39  ;;  %2594 = vmatprep.subr.bf16.mxu0 %v3128_v36  ;;  %v3517_v40 = vpack.c.bf16 %v441_v38, %v440_v35  ;;  %s3131_s7 = smov 96   ;;  %s3132_s23 = smov 32  }
 0x120   :  { %vm3472_vm6 = vmand %vm433_vm4, %vm434_vm5  ;;  %vm475_vm8 = vcmask 1041409   ;;  %vm479_vm9 = vcmask 261120   ;;  %vm1853_vm11 = vcmask 130048   ;;  %vm2270_vm12 = vcmask 123904   ;;  %s3829_s16 = sld [smem:[#allocation38_spill]] }
 0x121   :  { %v247_v2 = vld [vmem:[%s3825_s3] sm:$0xff]  ;;  %v248_v4 = vld [vmem:[%s3825_s3 + $0x8] sm:$0xff]  ;;  %v3478_v17 = vsel %vm3472_vm6, 1.0, %v3126_v16  ;;  %v3490_v23 = vsel %vm3472_vm6, 0.0, %v3126_v16  ;;  %vm2275_vm14 = vcmask 255104   ;;  %vm2281_vm15 = vcmask 288000  }
 0x122   :  { %v244_v3 = vld [vmem:[%s3826_s28] sm:$0xff]  ;;  %v245_v5 = vld [vmem:[%s3826_s28 + $0x8] sm:$0xff]  ;;  %2430 = vmatprep.mubr.msk.f32.mxu1 %vm250_vm2, %v247_v2 }
 0x123   :  { %2435 = vmatprep.mubr.msk.f32.mxu0 %vm336_vm3, %v244_v3  ;;  %2431 = vmatmul.mubr.msk.f32.vlgmr.msra.gmra.mrb[0].mxu1 %vm250_vm2, %v248_v4 }
 0x124   :  { %2436 = vmatmul.mubr.msk.f32.vlgmr.msra.gmra.mrb[0].mxu0 %vm336_vm3, %v245_v5  ;;  %2446 = vmatprep.mubr.msk.f32.mxu1 %vm3129_vm7, %v3130_v39 }
 0x125   :  { %2479 = vmatprep.mubr.msk.f32.mxu0 %vm3129_vm7, %v3130_v39  ;;  %2578 = vmatpush3.bf16.msra.mxu1 %v3505_v37 }
 0x126   :  { %2596 = vmatpush3.bf16.msra.mxu0 %v3505_v37  ;;  %2579 = vmatprep.subr.bf16.mxu1 %v3128_v36 }
 0x127   :  { %2597 = vmatprep.subr.bf16.mxu0 %v3128_v36 }
 0x129   :  { %2581 = vmatpush3.bf16.msra.mxu1 %v3517_v40 }
 0x12a   :  { %2599 = vmatpush3.bf16.msra.mxu0 %v3517_v40  ;;  %2582 = vmatprep.subr.bf16.mxu1 %v3128_v36 }
 0x12b   :  { %2606 = vmatprep.subr.bf16.mxu0 %v3128_v36 }
 0x1f6   :  { %v2432_v9 = vpop.f32.mrb[0].mxu1 }
 0x1f7   :  { %v2437_v10 = vpop.f32.mrb[0].mxu0  ;;  %v327_v13 = vpop.f32.mrb[1].mxu1 }
 0x1f8   :  { %v419_v12 = vadd.f32 %v2437_v10, %v2432_v9  ;;  %v413_v14 = vpop.f32.mrb[1].mxu0 }
 0x1f9   :  { %v414_v15 = vadd.f32 %v413_v14, %v327_v13 }
 0x1fa   :  { %v3480_v18 = vadd.f32 %v2301_v11, %v419_v12 }
 0x1fb   :  { %v3482_v19 = vadd.f32 %v2301_v11, %v414_v15 }
 0x1fc   :  { %v443_v20 = vmul.f32 %v3478_v17, %v3480_v18 }
 0x1fd   :  { %v442_v21 = vmul.f32 %v3478_v17, %v3482_v19 }
 0x1fe   :  { %2716 = vtanh.f32 %v443_v20 }
 0x1ff   :  { %2718 = vtanh.f32 %v442_v21 }
 0x208   :  { %v2717_v22 = vpop.eup %2716 }
 0x209   :  { %v2719_v24 = vpop.eup %2718  ;;  %v447_v25 = vmul.f32 %v2717_v22, %v3478_v17 }
 0x20a   :  { %v446_v27 = vmul.f32 %v2719_v24, %v3478_v17 }
 0x20b   :  { %v449_v26 = vadd.f32 %v447_v25, %v3490_v23 }
 0x20c   :  { %v448_v28 = vadd.f32 %v446_v27, %v3490_v23 }
 0x20d   :  { %454 = vrot.lane.b32.xlu0 %v449_v26, %s3127_s30 }
 0x211   :  { %452 = vrot.lane.b32.xlu0 %v448_v28, %s3127_s30 }
 0x27f   :  { %v455_v29 = vpop.permute.xlu0 %454 }
 0x280   :  { %v3498_v30 = vmul.f32 %v455_v29, %v449_v26 }
 0x282   :  { %2720 = vtanh.f32 %v3498_v30  ;;  %v569_v63 = vrot.slane %v3498_v30, 7 }
 0x283   :  { %v453_v31 = vpop.permute.xlu0 %452 }
 0x284   :  { %v3501_v32 = vmul.f32 %v453_v31, %v448_v28 }
 0x286   :  { %2722 = vtanh.f32 %v3501_v32  ;;  %v568_v0 = vrot.slane %v3501_v32, 7 }
 0x28c   :  { %v2721_v41 = vpop.eup %2720 }
 0x28d   :  { %466 = vrot.lane.b32.xlu1 %v2721_v41, %s3131_s7 }
 0x290   :  { %v2723_v42 = vpop.eup %2722 }
 0x291   :  { %464 = vrot.lane.b32.xlu1 %v2723_v42, %s3131_s7 }
 0x2ff   :  { %v467_v43 = vpop.permute.xlu1 %466 }
 0x300   :  { %v471_v44 = vmul.f32 %v467_v43, %v449_v26 }
 0x302   :  { %v474_v46 = vrot.slane %v471_v44, 7 }
 0x303   :  { %v465_v45 = vpop.permute.xlu1 %464 }
 0x304   :  { %v470_v47 = vmul.f32 %v465_v45, %v448_v28 }
 0x306   :  { %v476_v48 = vsel %vm475_vm8, %v474_v46, %v470_v47 }
 0x307   :  { %477 = vrot.lane.b32.xlu0 %v476_v48, %s3132_s23 }
 0x379   :  { %v478_v49 = vpop.permute.xlu0 %477 }
 0x37a   :  { %2447 = vmatmul.mubr.msk.f32.vlgmr.msra.gmra.mrb[2].mxu1 %vm479_vm9, %v478_v49 }
 0x37b   :  { %2584 = vmatpush3.bf16.msra.mxu1 %v3505_v37  ;;  %2457 = vmatprep.mubr.msk.f32.mxu1 %vm3129_vm7, %v3130_v39 }
 0x37c   :  { %2585 = vmatprep.subr.bf16.mxu1 %v3128_v36 }
 0x37f   :  { %2587 = vmatpush3.bf16.msra.mxu1 %v3517_v40 }
 0x380   :  { %2588 = vmatprep.subr.bf16.mxu1 %v3128_v36 }
 0x44d   :  { %v548_v50 = vpop.f32.mrb[2].mxu1 }
 0x44e   :  { %v553_v51 = vrot.slane %v548_v50, 7  ;;  %v557_v52 = vadd.f32 %v548_v50, %v3480_v18  ;;  %v2448_v53 = vpop.f32.mrb[3].mxu1 }
 0x450   :  { %v556_v54 = vadd.f32 %v553_v51, %v3482_v19  ;;  %v559_v55 = vmul.f32 %v557_v52, %v3478_v17 }
 0x452   :  { %v558_v56 = vmul.f32 %v556_v54, %v3478_v17  ;;  %2724 = vtanh.f32 %v559_v55 }
 0x454   :  { %2726 = vtanh.f32 %v558_v56 }
 0x45c   :  { %v2725_v57 = vpop.eup %2724 }
 0x45d   :  { %v563_v58 = vmul.f32 %v2725_v57, %v3478_v17 }
 0x45e   :  { %v2727_v59 = vpop.eup %2726 }
 0x45f   :  { %v565_v60 = vadd.f32 %v563_v58, %v3490_v23  ;;  %v562_v61 = vmul.f32 %v2727_v59, %v3478_v17 }
 0x461   :  { %582 = vrot.lane.b32.xlu0 %v565_v60, %s3127_s30  ;;  %v564_v62 = vadd.f32 %v562_v61, %v3490_v23 }
 0x463   :  { %580 = vrot.lane.b32.xlu1 %v564_v62, %s3127_s30 }
 0x465   :  { %572 = vrot.lane.b32.xlu0 %v569_v63, %s3132_s23 }
 0x467   :  { %570 = vrot.lane.b32.xlu1 %v568_v0, %s3132_s23 }
 0x4d3   :  { %v583_v1 = vpop.permute.xlu0 %582 }
 0x4d4   :  { %v587_v2 = vmul.f32 %v583_v1, %v565_v60 }
 0x4d5   :  { %v581_v3 = vpop.permute.xlu1 %580 }
 0x4d6   :  { %v586_v4 = vmul.f32 %v581_v3, %v564_v62  ;;  %592 = vrot.lane.b32.xlu0 %v587_v2, %s3132_s23 }
 0x4d7   :  { %v573_v5 = vpop.permute.xlu0 %572 }
 0x4d8   :  { %590 = vrot.lane.b32.xlu1 %v586_v4, %s3132_s23  ;;  %v577_v8 = vmul.f32 %v573_v5, %v565_v60 }
 0x4d9   :  { %v571_v7 = vpop.permute.xlu1 %570 }
 0x4da   :  { %v576_v10 = vmul.f32 %v571_v7, %v564_v62 }
 0x548   :  { %v593_v9 = vpop.permute.xlu0 %592 }
 0x549   :  { %v597_v11 = vadd.f32 %v593_v9, %v577_v8 }
 0x54a   :  { %v591_v12 = vpop.permute.xlu1 %590 }
 0x54b   :  { %2728 = vtanh.f32 %v597_v11  ;;  %v596_v13 = vadd.f32 %v591_v12, %v576_v10  ;;  %v706_v50 = vrot.slane %v597_v11, 7 }
 0x54d   :  { %2730 = vtanh.f32 %v596_v13  ;;  %v705_v49 = vrot.slane %v596_v13, 7 }
 0x555   :  { %v2729_v14 = vpop.eup %2728 }
 0x556   :  { %604 = vrot.lane.b32.xlu0 %v2729_v14, %s3127_s30 }
 0x557   :  { %v2731_v15 = vpop.eup %2730 }
 0x558   :  { %602 = vrot.lane.b32.xlu1 %v2731_v15, %s3127_s30 }
 0x5c8   :  { %v605_v16 = vpop.permute.xlu0 %604 }
 0x5c9   :  { %v609_v22 = vmul.f32 %v605_v16, %v565_v60 }
 0x5ca   :  { %v603_v20 = vpop.permute.xlu1 %602 }
 0x5cb   :  { %v608_v21 = vmul.f32 %v603_v20, %v564_v62 }
 0x5cd   :  { %v612_v24 = vrot.slane %v608_v21, 1 }
 0x5cf   :  { %v613_v25 = vsel %vm475_vm8, %v609_v22, %v612_v24 }
 0x5d0   :  { %614 = vrot.lane.b32.xlu1 %v613_v25, %s3132_s23 }
 0x642   :  { %v615_v26 = vpop.permute.xlu1 %614 }
 0x643   :  { %2458 = vmatmul.mubr.msk.f32.vlgmr.msra.gmra.mrb[4].mxu1 %vm479_vm9, %v615_v26 }
 0x644   :  { %2590 = vmatpush3.bf16.msra.mxu1 %v3505_v37  ;;  %2468 = vmatprep.mubr.msk.f32.mxu1 %vm3129_vm7, %v3130_v39 }
 0x645   :  { %2591 = vmatprep.subr.bf16.mxu1 %v3128_v36 }
 0x648   :  { %2593 = vmatpush3.bf16.msra.mxu1 %v3517_v40 }
 0x649   :  { %2600 = vmatprep.subr.bf16.mxu1 %v3128_v36 }
 0x716   :  { %v684_v27 = vpop.f32.mrb[4].mxu1 }
 0x717   :  { %v689_v28 = vrot.slane %v684_v27, 6  ;;  %v690_v29 = vrot.slane %v684_v27, 7  ;;  %v2459_v30 = vpop.f32.mrb[5].mxu1 }
 0x719   :  { %v693_v31 = vadd.f32 %v689_v28, %v3482_v19  ;;  %v694_v32 = vadd.f32 %v690_v29, %v3480_v18 }
 0x71b   :  { %v695_v33 = vmul.f32 %v693_v31, %v3478_v17  ;;  %v696_v34 = vmul.f32 %v694_v32, %v3478_v17 }
 0x71d   :  { %2732 = vtanh.f32 %v695_v33 }
 0x71e   :  { %2734 = vtanh.f32 %v696_v34 }
 0x727   :  { %v2733_v35 = vpop.eup %2732 }
 0x728   :  { %v2735_v38 = vpop.eup %2734  ;;  %v699_v41 = vmul.f32 %v2733_v35, %v3478_v17 }
 0x729   :  { %v700_v42 = vmul.f32 %v2735_v38, %v3478_v17 }
 0x72a   :  { %v701_v43 = vadd.f32 %v699_v41, %v3490_v23 }
 0x72b   :  { %v702_v44 = vadd.f32 %v700_v42, %v3490_v23 }
 0x72c   :  { %713 = vrot.lane.b32.xlu0 %v701_v43, %s3127_s30  ;;  %v709_v51 = vmul.f32 %v705_v49, %v701_v43 }
 0x72d   :  { %715 = vrot.lane.b32.xlu1 %v702_v44, %s3127_s30  ;;  %v710_v52 = vmul.f32 %v706_v50, %v702_v44 }
 0x79e   :  { %v714_v45 = vpop.permute.xlu0 %713 }
 0x79f   :  { %v716_v46 = vpop.permute.xlu1 %715  ;;  %v719_v47 = vmul.f32 %v714_v45, %v701_v43 }
 0x7a0   :  { %v720_v48 = vmul.f32 %v716_v46, %v702_v44 }
 0x7a1   :  { %723 = vrot.lane.b32.xlu0 %v719_v47, %s3132_s23 }
 0x7a2   :  { %725 = vrot.lane.b32.xlu1 %v720_v48, %s3132_s23 }
 0x813   :  { %v724_v53 = vpop.permute.xlu0 %723 }
 0x814   :  { %v726_v54 = vpop.permute.xlu1 %725  ;;  %v729_v55 = vadd.f32 %v724_v53, %v709_v51 }
 0x815   :  { %v730_v56 = vadd.f32 %v726_v54, %v710_v52 }
 0x816   :  { %2736 = vtanh.f32 %v729_v55  ;;  %v839_v26 = vrot.slane %v729_v55, 7 }
 0x817   :  { %2738 = vtanh.f32 %v730_v56  ;;  %v840_v27 = vrot.slane %v730_v56, 7 }
 0x820   :  { %v2737_v57 = vpop.eup %2736 }
 0x821   :  { %v2739_v58 = vpop.eup %2738  ;;  %735 = vrot.lane.b32.xlu0 %v2737_v57, %s3127_s30 }
 0x822   :  { %737 = vrot.lane.b32.xlu1 %v2739_v58, %s3127_s30 }
 0x893   :  { %v736_v59 = vpop.permute.xlu0 %735 }
 0x894   :  { %v738_v60 = vpop.permute.xlu1 %737  ;;  %v741_v61 = vmul.f32 %v736_v59, %v701_v43 }
 0x895   :  { %v742_v62 = vmul.f32 %v738_v60, %v702_v44 }
 0x896   :  { %v745_v63 = vrot.slane %v741_v61, 2 }
 0x897   :  { %v746_v0 = vrot.slane %v742_v62, 1 }
 0x899   :  { %v747_v1 = vsel %vm475_vm8, %v746_v0, %v745_v63 }
 0x89a   :  { %748 = vrot.lane.b32.xlu0 %v747_v1, %s3132_s23 }
 0x90c   :  { %v749_v2 = vpop.permute.xlu0 %748 }
 0x90d   :  { %2469 = vmatmul.mubr.msk.f32.vlgmr.msra.gmra.mrb[6].mxu1 %vm479_vm9, %v749_v2 }
 0x90e   :  { %2602 = vmatpush3.bf16.msra.mxu1 %v3505_v37  ;;  %2490 = vmatprep.mubr.msk.f32.mxu1 %vm3129_vm7, %v3130_v39 }
 0x90f   :  { %2603 = vmatprep.subr.bf16.mxu1 %v3128_v36 }
 0x912   :  { %2605 = vmatpush3.bf16.msra.mxu1 %v3517_v40 }
 0x913   :  { %2612 = vmatprep.subr.bf16.mxu1 %v3128_v36 }
 0x9e0   :  { %v818_v3 = vpop.f32.mrb[6].mxu1 }
 0x9e1   :  { %v823_v4 = vrot.slane %v818_v3, 5  ;;  %v824_v5 = vrot.slane %v818_v3, 6  ;;  %v2470_v7 = vpop.f32.mrb[7].mxu1 }
 0x9e3   :  { %v827_v8 = vadd.f32 %v823_v4, %v3482_v19  ;;  %v828_v9 = vadd.f32 %v824_v5, %v3480_v18 }
 0x9e5   :  { %v829_v10 = vmul.f32 %v827_v8, %v3478_v17  ;;  %v830_v11 = vmul.f32 %v828_v9, %v3478_v17 }
 0x9e7   :  { %2740 = vtanh.f32 %v829_v10 }
 0x9e8   :  { %2742 = vtanh.f32 %v830_v11 }
 0x9f1   :  { %v2741_v12 = vpop.eup %2740 }
 0x9f2   :  { %v2743_v13 = vpop.eup %2742  ;;  %v833_v14 = vmul.f32 %v2741_v12, %v3478_v17 }
 0x9f3   :  { %v834_v15 = vmul.f32 %v2743_v13, %v3478_v17 }
 0x9f4   :  { %v835_v16 = vadd.f32 %v833_v14, %v3490_v23 }
 0x9f5   :  { %v836_v20 = vadd.f32 %v834_v15, %v3490_v23 }
 0x9f6   :  { %847 = vrot.lane.b32.xlu1 %v835_v16, %s3127_s30  ;;  %v843_v28 = vmul.f32 %v839_v26, %v835_v16 }
 0x9f7   :  { %849 = vrot.lane.b32.xlu0 %v836_v20, %s3127_s30  ;;  %v844_v29 = vmul.f32 %v840_v27, %v836_v20 }
 0xa68   :  { %v848_v21 = vpop.permute.xlu1 %847 }
 0xa69   :  { %v850_v22 = vpop.permute.xlu0 %849  ;;  %v853_v24 = vmul.f32 %v848_v21, %v835_v16 }
 0xa6a   :  { %v854_v25 = vmul.f32 %v850_v22, %v836_v20 }
 0xa6b   :  { %857 = vrot.lane.b32.xlu1 %v853_v24, %s3132_s23 }
 0xa6c   :  { %859 = vrot.lane.b32.xlu0 %v854_v25, %s3132_s23 }
 0xadd   :  { %v858_v30 = vpop.permute.xlu1 %857 }
 0xade   :  { %v860_v31 = vpop.permute.xlu0 %859  ;;  %v863_v32 = vadd.f32 %v858_v30, %v843_v28 }
 0xadf   :  { %v864_v33 = vadd.f32 %v860_v31, %v844_v29 }
 0xae0   :  { %2744 = vtanh.f32 %v863_v32  ;;  %v973_v2 = vrot.slane %v863_v32, 7 }
 0xae1   :  { %2746 = vtanh.f32 %v864_v33  ;;  %v974_v3 = vrot.slane %v864_v33, 7 }
 0xaea   :  { %v2745_v34 = vpop.eup %2744 }
 0xaeb   :  { %v2747_v35 = vpop.eup %2746  ;;  %869 = vrot.lane.b32.xlu1 %v2745_v34, %s3127_s30 }
 0xaec   :  { %871 = vrot.lane.b32.xlu0 %v2747_v35, %s3127_s30 }
 0xb5d   :  { %v870_v38 = vpop.permute.xlu1 %869 }
 0xb5e   :  { %v872_v41 = vpop.permute.xlu0 %871  ;;  %v875_v42 = vmul.f32 %v870_v38, %v835_v16 }
 0xb5f   :  { %v876_v43 = vmul.f32 %v872_v41, %v836_v20 }
 0xb60   :  { %v879_v44 = vrot.slane %v875_v42, 3 }
 0xb61   :  { %v880_v45 = vrot.slane %v876_v43, 2 }
 0xb63   :  { %v881_v46 = vsel %vm475_vm8, %v880_v45, %v879_v44 }
 0xb64   :  { %882 = vrot.lane.b32.xlu1 %v881_v46, %s3132_s23 }
 0xbd6   :  { %v883_v47 = vpop.permute.xlu1 %882 }
 0xbd7   :  { %2480 = vmatmul.mubr.msk.f32.vlgmr.msra.gmra.mrb[2].mxu0 %vm479_vm9, %v883_v47 }
 0xbd8   :  { %2608 = vmatpush3.bf16.msra.mxu0 %v3505_v37  ;;  %2501 = vmatprep.mubr.msk.f32.mxu0 %vm3129_vm7, %v3130_v39 }
 0xbd9   :  { %2609 = vmatprep.subr.bf16.mxu0 %v3128_v36 }
 0xbdc   :  { %2611 = vmatpush3.bf16.msra.mxu0 %v3517_v40 }
 0xbdd   :  { %2618 = vmatprep.subr.bf16.mxu0 %v3128_v36 }
 0xcaa   :  { %v952_v48 = vpop.f32.mrb[2].mxu0 }
 0xcab   :  { %v957_v49 = vrot.slane %v952_v48, 4  ;;  %v958_v50 = vrot.slane %v952_v48, 5  ;;  %v2481_v51 = vpop.f32.mrb[3].mxu0 }
 0xcad   :  { %v961_v52 = vadd.f32 %v957_v49, %v3482_v19  ;;  %v962_v53 = vadd.f32 %v958_v50, %v3480_v18 }
 0xcaf   :  { %v963_v54 = vmul.f32 %v961_v52, %v3478_v17  ;;  %v964_v55 = vmul.f32 %v962_v53, %v3478_v17 }
 0xcb1   :  { %2748 = vtanh.f32 %v963_v54 }
 0xcb2   :  { %2750 = vtanh.f32 %v964_v55 }
 0xcbb   :  { %v2749_v56 = vpop.eup %2748 }
 0xcbc   :  { %v2751_v57 = vpop.eup %2750  ;;  %v967_v58 = vmul.f32 %v2749_v56, %v3478_v17 }
 0xcbd   :  { %v968_v59 = vmul.f32 %v2751_v57, %v3478_v17 }
 0xcbe   :  { %v969_v60 = vadd.f32 %v967_v58, %v3490_v23 }
 0xcbf   :  { %v970_v61 = vadd.f32 %v968_v59, %v3490_v23 }
 0xcc0   :  { %981 = vrot.lane.b32.xlu0 %v969_v60, %s3127_s30  ;;  %v977_v4 = vmul.f32 %v973_v2, %v969_v60 }
 0xcc1   :  { %983 = vrot.lane.b32.xlu1 %v970_v61, %s3127_s30  ;;  %v978_v5 = vmul.f32 %v974_v3, %v970_v61 }
 0xd32   :  { %v982_v62 = vpop.permute.xlu0 %981 }
 0xd33   :  { %v984_v63 = vpop.permute.xlu1 %983  ;;  %v987_v0 = vmul.f32 %v982_v62, %v969_v60 }
 0xd34   :  { %v988_v1 = vmul.f32 %v984_v63, %v970_v61 }
 0xd35   :  { %991 = vrot.lane.b32.xlu0 %v987_v0, %s3132_s23 }
 0xd36   :  { %993 = vrot.lane.b32.xlu1 %v988_v1, %s3132_s23 }
 0xda7   :  { %v992_v7 = vpop.permute.xlu0 %991 }
 0xda8   :  { %v994_v8 = vpop.permute.xlu1 %993  ;;  %v997_v9 = vadd.f32 %v992_v7, %v977_v4 }
 0xda9   :  { %v998_v10 = vadd.f32 %v994_v8, %v978_v5 }
 0xdaa   :  { %2752 = vtanh.f32 %v997_v9  ;;  %v1107_v45 = vrot.slane %v997_v9, 7 }
 0xdab   :  { %2754 = vtanh.f32 %v998_v10  ;;  %v1108_v46 = vrot.slane %v998_v10, 7 }
 0xdb4   :  { %v2753_v11 = vpop.eup %2752 }
 0xdb5   :  { %v2755_v12 = vpop.eup %2754  ;;  %1003 = vrot.lane.b32.xlu0 %v2753_v11, %s3127_s30 }
 0xdb6   :  { %1005 = vrot.lane.b32.xlu1 %v2755_v12, %s3127_s30 }
 0xe27   :  { %v1004_v13 = vpop.permute.xlu0 %1003 }
 0xe28   :  { %v1006_v14 = vpop.permute.xlu1 %1005  ;;  %v1009_v15 = vmul.f32 %v1004_v13, %v969_v60 }
 0xe29   :  { %v1010_v16 = vmul.f32 %v1006_v14, %v970_v61 }
 0xe2a   :  { %v1013_v20 = vrot.slane %v1009_v15, 4 }
 0xe2b   :  { %v1014_v21 = vrot.slane %v1010_v16, 3 }
 0xe2d   :  { %v1015_v22 = vsel %vm475_vm8, %v1014_v21, %v1013_v20 }
 0xe2e   :  { %1016 = vrot.lane.b32.xlu0 %v1015_v22, %s3132_s23 }
 0xea0   :  { %v1017_v24 = vpop.permute.xlu0 %1016 }
 0xea1   :  { %2491 = vmatmul.mubr.msk.f32.vlgmr.msra.gmra.mrb[8].mxu1 %vm479_vm9, %v1017_v24 }
 0xea2   :  { %2614 = vmatpush3.bf16.msra.mxu1 %v3505_v37  ;;  %2512 = vmatprep.mubr.msk.f32.mxu1 %vm3129_vm7, %v3130_v39 }
 0xea3   :  { %2615 = vmatprep.subr.bf16.mxu1 %v3128_v36 }
 0xea6   :  { %2617 = vmatpush3.bf16.msra.mxu1 %v3517_v40 }
 0xea7   :  { %2526 = vmatprep.subr.mxu1 %v3130_v39 }
 0xf74   :  { %v1086_v25 = vpop.f32.mrb[8].mxu1 }
 0xf75   :  { %v1091_v26 = vrot.slane %v1086_v25, 3  ;;  %v1092_v27 = vrot.slane %v1086_v25, 4  ;;  %v2492_v28 = vpop.f32.mrb[9].mxu1 }
 0xf77   :  { %v1095_v29 = vadd.f32 %v1091_v26, %v3482_v19  ;;  %v1096_v30 = vadd.f32 %v1092_v27, %v3480_v18 }
 0xf79   :  { %v1097_v31 = vmul.f32 %v1095_v29, %v3478_v17  ;;  %v1098_v37 = vmul.f32 %v1096_v30, %v3478_v17 }
 0xf7b   :  { %2756 = vtanh.f32 %v1097_v31 }
 0xf7c   :  { %2758 = vtanh.f32 %v1098_v37 }
 0xf85   :  { %v2757_v32 = vpop.eup %2756 }
 0xf86   :  { %v2759_v33 = vpop.eup %2758  ;;  %v1101_v40 = vmul.f32 %v2757_v32, %v3478_v17 }
 0xf87   :  { %v1102_v34 = vmul.f32 %v2759_v33, %v3478_v17 }
 0xf88   :  { %v1103_v35 = vadd.f32 %v1101_v40, %v3490_v23 }
 0xf89   :  { %v1104_v38 = vadd.f32 %v1102_v34, %v3490_v23 }
 0xf8a   :  { %1115 = vrot.lane.b32.xlu1 %v1103_v35, %s3127_s30  ;;  %v1111_v47 = vmul.f32 %v1107_v45, %v1103_v35 }
 0xf8b   :  { %1117 = vrot.lane.b32.xlu0 %v1104_v38, %s3127_s30  ;;  %v1112_v48 = vmul.f32 %v1108_v46, %v1104_v38 }
 0xffc   :  { %v1116_v41 = vpop.permute.xlu1 %1115 }
 0xffd   :  { %v1118_v42 = vpop.permute.xlu0 %1117  ;;  %v1121_v43 = vmul.f32 %v1116_v41, %v1103_v35 }
 0xffe   :  { %v1122_v44 = vmul.f32 %v1118_v42, %v1104_v38 }
 0xfff   :  { %1125 = vrot.lane.b32.xlu1 %v1121_v43, %s3132_s23 }
0x1000   :  { %1127 = vrot.lane.b32.xlu0 %v1122_v44, %s3132_s23 }
0x1071   :  { %v1126_v49 = vpop.permute.xlu1 %1125 }
0x1072   :  { %v1128_v50 = vpop.permute.xlu0 %1127  ;;  %v1131_v51 = vadd.f32 %v1126_v49, %v1111_v47 }
0x1073   :  { %v1132_v52 = vadd.f32 %v1128_v50, %v1112_v48 }
0x1074   :  { %2760 = vtanh.f32 %v1131_v51  ;;  %v1241_v21 = vrot.slane %v1131_v51, 7 }
0x1075   :  { %2762 = vtanh.f32 %v1132_v52  ;;  %v1242_v22 = vrot.slane %v1132_v52, 7 }
0x107e   :  { %v2761_v53 = vpop.eup %2760 }
0x107f   :  { %v2763_v54 = vpop.eup %2762  ;;  %1137 = vrot.lane.b32.xlu1 %v2761_v53, %s3127_s30 }
0x1080   :  { %1139 = vrot.lane.b32.xlu0 %v2763_v54, %s3127_s30 }
0x10f1   :  { %v1138_v55 = vpop.permute.xlu1 %1137 }
0x10f2   :  { %v1140_v56 = vpop.permute.xlu0 %1139  ;;  %v1143_v57 = vmul.f32 %v1138_v55, %v1103_v35 }
0x10f3   :  { %v1144_v58 = vmul.f32 %v1140_v56, %v1104_v38 }
0x10f4   :  { %v1147_v59 = vrot.slane %v1143_v57, 5 }
0x10f5   :  { %v1148_v60 = vrot.slane %v1144_v58, 4 }
0x10f7   :  { %v1149_v61 = vsel %vm475_vm8, %v1148_v60, %v1147_v59 }
0x10f8   :  { %1150 = vrot.lane.b32.xlu1 %v1149_v61, %s3132_s23 }
0x116a   :  { %v1151_v62 = vpop.permute.xlu1 %1150 }
0x116b   :  { %2502 = vmatmul.mubr.msk.f32.vlgmr.msra.gmra.mrb[4].mxu0 %vm479_vm9, %v1151_v62 }
0x116c   :  { %2523 = vmatprep.mubr.msk.f32.mxu0 %vm3129_vm7, %v3130_v39 }
0x123e   :  { %v1220_v63 = vpop.f32.mrb[4].mxu0 }
0x123f   :  { %v1225_v0 = vrot.slane %v1220_v63, 2  ;;  %v1226_v1 = vrot.slane %v1220_v63, 3  ;;  %v2503_v2 = vpop.f32.mrb[5].mxu0 }
0x1240   :  { %v1417_v2 = vld [vmem:[#allocation12 + $0x10] sm:$0xff] }
0x1241   :  { %v1229_v3 = vadd.f32 %v1225_v0, %v3482_v19  ;;  %v1230_v4 = vadd.f32 %v1226_v1, %v3480_v18  ;;  %v1415_v0 = vld [vmem:[#allocation12] sm:$0xff]  ;;  %v1416_v1 = vld [vmem:[#allocation12 + $0x8] sm:$0xff] }
0x1243   :  { %v1231_v5 = vmul.f32 %v1229_v3, %v3478_v17  ;;  %v1232_v7 = vmul.f32 %v1230_v4, %v3478_v17  ;;  %v2619_v3 = vpack.c.bf16 %v1416_v1, %v1415_v0  ;;  %v1418_v4 = vld [vmem:[#allocation12 + $0x18] sm:$0xff]  ;;  %v2314_v1 = vld [vmem:[#allocation16] ss:$0 sm:$0xff] }
0x1245   :  { %2764 = vtanh.f32 %v1231_v5  ;;  %v1414_v5 = vld [vmem:[%s3794_s8] sm:$0xf]  ;;  %2620 = vmatpush3.bf16.msra.mxu0 %v2619_v3 }
0x1246   :  { %2766 = vtanh.f32 %v1232_v7  ;;  %v1413_v7 = vld [vmem:[#allocation2] sm:$0x3]  ;;  %2621 = vmatprep.subr.bf16.mxu0 %v3128_v36 }
0x124f   :  { %v2765_v8 = vpop.eup %2764 }
0x1250   :  { %v2767_v9 = vpop.eup %2766  ;;  %v1235_v10 = vmul.f32 %v2765_v8, %v3478_v17  ;;  %v1679_v8 = vld [vmem:[%s3799_s13 + $0x8] sm:$0xff] }
0x1251   :  { %v1236_v11 = vmul.f32 %v2767_v9, %v3478_v17  ;;  %v1682_v9 = vld [vmem:[%s3799_s13 + $0x20] sm:$0xff] }
0x1252   :  { %v1237_v12 = vadd.f32 %v1235_v10, %v3490_v23  ;;  %v2622_v10 = vpack.c.bf16 %v1418_v4, %v1417_v2 }
0x1253   :  { %v1238_v13 = vadd.f32 %v1236_v11, %v3490_v23  ;;  %v2630_v11 = vpack.c.bf16 %v1682_v9, %v1679_v8 }
0x1254   :  { %1249 = vrot.lane.b32.xlu0 %v1237_v12, %s3127_s30  ;;  %v1245_v24 = vmul.f32 %v1241_v21, %v1237_v12  ;;  %2623 = vmatpush3.bf16.msra.mxu0 %v2622_v10  ;;  %v2023_v10 = vld [vmem:[#allocation21 + $0x80] sm:$0xff] }
0x1255   :  { %1251 = vrot.lane.b32.xlu1 %v1238_v13, %s3127_s30  ;;  %v1246_v25 = vmul.f32 %v1242_v22, %v1238_v13  ;;  %2631 = vmatprep.subr.bf16.mxu0 %v2630_v11  ;;  %v2024_v11 = vld [vmem:[#allocation21 + $0x88] sm:$0xff] }
0x12c6   :  { %v1250_v14 = vpop.permute.xlu0 %1249 }
0x12c7   :  { %v1252_v15 = vpop.permute.xlu1 %1251  ;;  %v1255_v16 = vmul.f32 %v1250_v14, %v1237_v12 }
0x12c8   :  { %v1256_v20 = vmul.f32 %v1252_v15, %v1238_v13 }
0x12c9   :  { %1259 = vrot.lane.b32.xlu0 %v1255_v16, %s3132_s23 }
0x12ca   :  { %1261 = vrot.lane.b32.xlu1 %v1256_v20, %s3132_s23 }
0x133b   :  { %v1260_v26 = vpop.permute.xlu0 %1259 }
0x133c   :  { %v1262_v27 = vpop.permute.xlu1 %1261  ;;  %v1265_v28 = vadd.f32 %v1260_v26, %v1245_v24 }
0x133d   :  { %v1266_v29 = vadd.f32 %v1262_v27, %v1246_v25  ;;  %v1678_v27 = vld [vmem:[%s3799_s13] sm:$0xff] }
0x133e   :  { %2768 = vtanh.f32 %v1265_v28  ;;  %v1375_v58 = vrot.slane %v1265_v28, 7  ;;  %v1681_v28 = vld [vmem:[%s3799_s13 + $0x18] sm:$0xff] }
0x133f   :  { %2770 = vtanh.f32 %v1266_v29  ;;  %v1376_v59 = vrot.slane %v1266_v29, 7  ;;  %v1685_v29 = vld [vmem:[%s3799_s13 + $0x38] sm:$0xff] }
0x1348   :  { %v2769_v30 = vpop.eup %2768 }
0x1349   :  { %v2771_v31 = vpop.eup %2770  ;;  %1271 = vrot.lane.b32.xlu0 %v2769_v30, %s3127_s30  ;;  %v1688_v30 = vld [vmem:[%s3799_s13 + $0x50] sm:$0xff] }
0x134a   :  { %1273 = vrot.lane.b32.xlu1 %v2771_v31, %s3127_s30  ;;  %v2632_v31 = vpack.c.bf16 %v1681_v28, %v1678_v27  ;;  %v2009_v28 = vld [vmem:[#allocation21 + $0x10] sm:$0xff] }
0x13bb   :  { %v1272_v37 = vpop.permute.xlu0 %1271 }
0x13bc   :  { %v1274_v32 = vpop.permute.xlu1 %1273  ;;  %v1277_v33 = vmul.f32 %v1272_v37, %v1237_v12  ;;  %v2634_v37 = vpack.c.bf16 %v1688_v30, %v1685_v29  ;;  %v2010_v29 = vld [vmem:[#allocation21 + $0x18] sm:$0xff]  ;;  %v2027_v30 = vld [vmem:[#allocation21 + $0xa0] sm:$0xff] }
0x13bd   :  { %v1278_v40 = vmul.f32 %v1274_v32, %v1238_v13  ;;  %v1684_v32 = vld [vmem:[%s3799_s13 + $0x30] sm:$0xff] }
0x13be   :  { %v1281_v34 = vrot.slane %v1277_v33, 6  ;;  %v1687_v33 = vld [vmem:[%s3799_s13 + $0x48] sm:$0xff] }
0x13bf   :  { %v1282_v35 = vrot.slane %v1278_v40, 5 }
0x13c1   :  { %v1283_v38 = vsel %vm475_vm8, %v1282_v35, %v1281_v34  ;;  %v2636_v34 = vpack.c.bf16 %v1687_v33, %v1684_v32  ;;  %v1588_v35 = vld [vmem:[#allocation15] sm:$0xff]  ;;  %v2011_v33 = vld [vmem:[#allocation21 + $0x20] sm:$0xff] }
0x13c2   :  { %1284 = vrot.lane.b32.xlu0 %v1283_v38, %s3132_s23  ;;  %v1589_v38 = vld [vmem:[#allocation15 + $0x8] sm:$0xff] }
0x1434   :  { %v1285_v41 = vpop.permute.xlu0 %1284 }
0x1435   :  { %2513 = vmatmul.mubr.msk.f32.vlgmr.msra.gmra.mrb[10].mxu1 %vm479_vm9, %v1285_v41  ;;  %v1590_v41 = vld [vmem:[#allocation15 + $0x10] sm:$0xff] }
0x1436   :  { %2528 = vmatprep.mubr.msk.f32.mxu1 %vm3129_vm7, %v3130_v39  ;;  %2527 = vmatpush3.msk.msra.mxu1 %vm343_vm1, %v1414_v5 }
0x1437   :  { %2624 = vmatprep.subr.bf16.mxu1 %v3128_v36 }
0x1439   :  { %2529 = vmatmul.mubr.msk.f32.vlgmr.msra.gmra.mrb[12].mxu1 %vm336_vm3, %v1413_v7 }
0x143a   :  { %2539 = vmatprep.mubr.msk.f32.mxu1 %vm3129_vm7, %v3130_v39 }
0x1508   :  { %v1354_v42 = vpop.f32.mrb[10].mxu1 }
0x1509   :  { %v1359_v43 = vrot.slane %v1354_v42, 1  ;;  %v1360_v44 = vrot.slane %v1354_v42, 2  ;;  %v2514_v45 = vpop.f32.mrb[11].mxu1  ;;  %v2625_v42 = vpack.c.bf16 %v1589_v38, %v1588_v35  ;;  %v2030_v35 = vld [vmem:[#allocation21 + $0xb8] sm:$0xff] }
0x150b   :  { %v1363_v46 = vadd.f32 %v1359_v43, %v3482_v19  ;;  %v1364_v47 = vadd.f32 %v1360_v44, %v3480_v18  ;;  %v1591_v43 = vld [vmem:[#allocation15 + $0x18] sm:$0xff]  ;;  %2626 = vmatpush3.bf16.msra.mxu1 %v2625_v42  ;;  %v2013_v42 = vld [vmem:[#allocation21 + $0x30] sm:$0xff] }
0x150c   :  { %v1570_v25 = vpop.f32.mrb[12].mxu1  ;;  %v2628_v44 = vpack.c.bf16 %v1591_v43, %v1590_v41  ;;  %2627 = vmatprep.subr.bf16.mxu1 %v3128_v36  ;;  %v2014_v43 = vld [vmem:[#allocation21 + $0x38] sm:$0xff] }
0x150d   :  { %v1365_v48 = vmul.f32 %v1363_v46, %v3478_v17  ;;  %v1366_v49 = vmul.f32 %v1364_v47, %v3478_v17  ;;  %v2530_v26 = vpop.f32.mrb[13].mxu1  ;;  %v2312_v46 = vld [vmem:[#allocation13] ss:$0 sm:$0xff] }
0x150f   :  { %2772 = vtanh.f32 %v1365_v48  ;;  %2629 = vmatpush3.bf16.msra.mxu1 %v2628_v44  ;;  %v2031_v44 = vld [vmem:[#allocation21 + $0xc0] sm:$0xff] }
0x1510   :  { %2774 = vtanh.f32 %v1366_v49  ;;  %2638 = vmatprep.subr.bf16.mxu1 %v3128_v36 }
0x1519   :  { %v2773_v50 = vpop.eup %2772 }
0x151a   :  { %v2775_v51 = vpop.eup %2774  ;;  %v1369_v52 = vmul.f32 %v2773_v50, %v3478_v17 }
0x151b   :  { %v1370_v53 = vmul.f32 %v2775_v51, %v3478_v17 }
0x151c   :  { %v1371_v54 = vadd.f32 %v1369_v52, %v3490_v23 }
0x151d   :  { %v1372_v55 = vadd.f32 %v1370_v53, %v3490_v23 }
0x151e   :  { %1383 = vrot.lane.b32.xlu1 %v1371_v54, %s3127_s30  ;;  %v1379_v60 = vmul.f32 %v1375_v58, %v1371_v54  ;;  %v1689_v58 = vld [vmem:[%s3799_s13 + $0x58] sm:$0xff] }
0x151f   :  { %1385 = vrot.lane.b32.xlu0 %v1372_v55, %s3127_s30  ;;  %v1380_v17 = vmul.f32 %v1376_v59, %v1372_v55 }
0x1590   :  { %v1384_v18 = vpop.permute.xlu1 %1383 }
0x1591   :  { %v1386_v19 = vpop.permute.xlu0 %1385  ;;  %v1389_v56 = vmul.f32 %v1384_v18, %v1371_v54 }
0x1592   :  { %v1390_v57 = vmul.f32 %v1386_v19, %v1372_v55 }
0x1593   :  { %1393 = vrot.lane.b32.xlu1 %v1389_v56, %s3132_s23 }
0x1594   :  { %1395 = vrot.lane.b32.xlu0 %v1390_v57, %s3132_s23  ;;  %v1686_v57 = vld [vmem:[%s3799_s13 + $0x40] sm:$0xff] }
0x1605   :  { %v1394_v61 = vpop.permute.xlu1 %1393 }
0x1606   :  { %v1396_v62 = vpop.permute.xlu0 %1395  ;;  %v1399_v63 = vadd.f32 %v1394_v61, %v1379_v60  ;;  %v2642_v60 = vpack.c.bf16 %v1689_v58, %v1686_v57  ;;  %v1852_v61 = vld [vmem:[#allocation19 + $0x18] sm:$0xff]  ;;  %v2036_v57 = vld [vmem:[#allocation21 + $0xe8] sm:$0xff] }
0x1607   :  { %v1400_v23 = vadd.f32 %v1396_v62, %v1380_v17  ;;  %v1850_v17 = vld [vmem:[#allocation19 + $0x8] sm:$0xff] }
0x1608   :  { %2776 = vtanh.f32 %v1399_v63  ;;  %v2644_v62 = vpack.c.bf16 %v1852_v61, %v1850_v17  ;;  %v1849_v63 = vld [vmem:[#allocation19] sm:$0xff]  ;;  %v2020_v17 = vld [vmem:[#allocation21 + $0x68] sm:$0xff] }
0x1609   :  { %2778 = vtanh.f32 %v1400_v23  ;;  %v1851_v23 = vld [vmem:[#allocation19 + $0x10] sm:$0xff] }
0x160a   :  { %v2646_v0 = vpack.c.bf16 %v1851_v23, %v1849_v63  ;;  %v2041_v63 = vld [vmem:[#allocation22 + $0x8] sm:$0xff] }
0x1612   :  { %v2777_v12 = vpop.eup %2776 }
0x1613   :  { %v2779_v13 = vpop.eup %2778  ;;  %1405 = vrot.lane.b32.xlu1 %v2777_v12, %s3127_s30 }
0x1614   :  { %1407 = vrot.lane.b32.xlu0 %v2779_v13, %s3127_s30 }
0x1685   :  { %v1406_v14 = vpop.permute.xlu1 %1405 }
0x1686   :  { %v1408_v15 = vpop.permute.xlu0 %1407  ;;  %v1411_v16 = vmul.f32 %v1406_v14, %v1371_v54  ;;  %v1680_v54 = vld [vmem:[%s3799_s13 + $0x10] sm:$0xff]  ;;  %v1928_v14 = vld [vmem:[%s3805_s19] sm:$0x3] }
0x1687   :  { %v1412_v20 = vmul.f32 %v1408_v15, %v1372_v55  ;;  %v1683_v55 = vld [vmem:[%s3799_s13 + $0x28] sm:$0xff]  ;;  %v2654_v15 = vpack.c.bf16 %v2024_v11, %v2023_v10  ;;  %v1693_v11 = vshrl.u32 %v431_v6, 7 }
0x1688   :  { %v1421_v21 = vrot.slane %v1411_v16, 7  ;;  %v2639_v56 = vpack.c.bf16 %v1683_v55, %v1680_v54  ;;  %v2007_v16 = vld [vmem:[#allocation21] sm:$0xff] }
0x1689   :  { %v1422_v22 = vrot.slane %v1412_v20, 6  ;;  %v2008_v20 = vld [vmem:[#allocation21 + $0x8] sm:$0xff] }
0x168a   :  { %v2656_v26 = vpack.c.bf16 %v2008_v20, %v2007_v16  ;;  %v1702_v16 = vsub.s32 2, %v1693_v11 }
0x168b   :  { %v1423_v24 = vsel %vm475_vm8, %v1422_v22, %v1421_v21  ;;  %v2025_v22 = vld [vmem:[#allocation21 + $0x90] sm:$0xff] }
0x168c   :  { %1424 = vrot.lane.b32.xlu1 %v1423_v24, %s3132_s23  ;;  %v2026_v24 = vld [vmem:[#allocation21 + $0x98] sm:$0xff] }
0x168d   :  { %v2658_v27 = vpack.c.bf16 %v2026_v24, %v2025_v22 }
0x16fe   :  { %v1425_v40 = vpop.permute.xlu1 %1424 }
0x16ff   :  { %2524 = vmatmul.mubr.msk.f32.vlgmr.msra.gmra.mrb[6].mxu0 %vm479_vm9, %v1425_v40 }
0x1700   :  { %2633 = vmatpush1.bf16.msra.mxu0 %v2632_v31  ;;  %1771 = vmatprep.mubr.f32.mxu0 %v3130_v39  ;;  %v2028_v31 = vld [vmem:[#allocation21 + $0xa8] sm:$0xff] }
0x1701   :  { %2635 = vmatprep.subr.bf16.mxu0 %v2634_v37  ;;  %v2660_v37 = vpack.c.bf16 %v2010_v29, %v2009_v28  ;;  %v2662_v32 = vpack.c.bf16 %v2028_v31, %v2027_v30  ;;  %v2188_v31 = vld [vmem:[#allocation18 + $0x8] sm:$0xff] }
0x1704   :  { %2637 = vmatpush1.bf16.msra.mxu0 %v2636_v34  ;;  %v2029_v34 = vld [vmem:[#allocation21 + $0xb0] sm:$0xff] }
0x1705   :  { %2645 = vmatprep.subr.bf16.mxu0 %v2644_v62  ;;  %v2666_v41 = vpack.c.bf16 %v2030_v35, %v2029_v34  ;;  %v2040_v62 = vld [vmem:[#allocation22] sm:$0xff] }
0x1706   :  { %v2649_v23 = vpack.c.bf16 %v2041_v63, %v2040_v62 }
0x1707   :  { %2317 = vmatmul.mubr.msk.f32.vlgmr.msra.gmra.mrb[8].mxu0 %vm479_vm9, %v1425_v40 }
0x1708   :  { %1921 = vmatprep.mubr.f32.mxu0 %v3130_v39  ;;  %2647 = vmatpush1.bf16.msra.mxu0 %v2646_v0  ;;  %v2037_v0 = vld [vmem:[#allocation21 + $0xf0] sm:$0xff] }
0x1709   :  { %2553 = vmatprep.subr.mxu0 %v3130_v39 }
0x17d2   :  { %v1494_v45 = vpop.f32.mrb[6].mxu0 }
0x17d3   :  { %v1571_v47 = vadd.f32 %v1570_v25, %v1494_v45  ;;  %v2525_v48 = vpop.f32.mrb[7].mxu0  ;;  %v1848_v25 = vld [vmem:[#allocation4] sm:$0x3]  ;;  %v2032_v45 = vld [vmem:[#allocation21 + $0xc8] sm:$0xff] }
0x17d4   :  { %v2015_v48 = vld [vmem:[#allocation21 + $0x40] sm:$0xff] }
0x17d5   :  { %v1581_v49 = vadd.f32 %v2312_v46, %v1571_v47  ;;  %v2668_v46 = vpack.c.bf16 %v2014_v43, %v2013_v42  ;;  %v2670_v47 = vpack.c.bf16 %v2032_v45, %v2031_v44 }
0x17d7   :  { %v1583_v50 = vmin.f32 %v1581_v49, 0.0  ;;  %vm1582_vm10 = vcmp.gt.f32.partialorder %v1581_v49, 0.0 }
0x17d9   :  { %v1584_v51 = vmul.f32 1.442695, %v1583_v50  ;;  %v2033_v50 = vld [vmem:[#allocation21 + $0xd0] sm:$0xff] }
0x17da   :  { %v3724_v52 = vpop.f32.mrb[8].mxu0 }
0x17db   :  { %2780 = vpow2.f32 %v1584_v51  ;;  %v3726_v53 = vpop.f32.mrb[9].mxu0  ;;  %v2034_v51 = vld [vmem:[#allocation21 + $0xd8] sm:$0xff] }
0x17dc   :  { %v2674_v55 = vpack.c.bf16 %v2034_v51, %v2033_v50 }
0x17e5   :  { %v2781_v18 = vpop.eup %2780 }
0x17e6   :  { %v2313_v19 = vadd.f32 -1.0, %v2781_v18  ;;  %v2017_v18 = vld [vmem:[#allocation21 + $0x50] sm:$0xff] }
0x17e8   :  { %v1587_v59 = vsel %vm1582_vm10, %v1581_v49, %v2313_v19  ;;  %v2016_v49 = vld [vmem:[#allocation21 + $0x48] sm:$0xff]  ;;  %v2018_v19 = vld [vmem:[#allocation21 + $0x58] sm:$0xff] }
0x17e9   :  { %2540 = vmatmul.mubr.msk.f32.vlgmr.msra.gmra.mrb[14].mxu1 %vm479_vm9, %v1587_v59  ;;  %v2672_v54 = vpack.c.bf16 %v2016_v49, %v2015_v48  ;;  %v2676_v58 = vpack.c.bf16 %v2018_v19, %v2017_v18 }
0x17ea   :  { %2640 = vmatpush3.bf16.msra.mxu1 %v2639_v56  ;;  %2550 = vmatprep.mubr.msk.f32.mxu1 %vm3129_vm7, %v3130_v39  ;;  %v2035_v56 = vld [vmem:[#allocation21 + $0xe0] sm:$0xff] }
0x17eb   :  { %2641 = vmatprep.subr.bf16.mxu1 %v3128_v36  ;;  %v2678_v59 = vpack.c.bf16 %v2036_v57, %v2035_v56 }
0x17ee   :  { %2643 = vmatpush3.bf16.msra.mxu1 %v2642_v60  ;;  %v2019_v60 = vld [vmem:[#allocation21 + $0x60] sm:$0xff] }
0x17ef   :  { %2648 = vmatprep.subr.bf16.mxu1 %v3128_v36  ;;  %v2680_v61 = vpack.c.bf16 %v2020_v17, %v2019_v60 }
0x17f1   :  { %2551 = vmatmul.mubr.msk.f32.vlgmr.msra.gmra.mrb[16].mxu1 %vm479_vm9, %v1425_v40  ;;  %v2012_v40 = vld [vmem:[#allocation21 + $0x28] sm:$0xff] }
0x17f2   :  { %2566 = vmatprep.mubr.msk.f32.mxu1 %vm3129_vm7, %v3130_v39  ;;  %v2664_v38 = vpack.c.bf16 %v2012_v40, %v2011_v33  ;;  %2650 = vmatpush3.bf16.msra.mxu1 %v2649_v23 }
0x17f3   :  { %2651 = vmatprep.subr.bf16.mxu1 %v3128_v36 }
0x18bc   :  { %v1668_v2 = vpop.f32.mrb[14].mxu1 }
0x18bd   :  { %v1669_v3 = vadd.f32 %v2314_v1, %v1668_v2  ;;  %v2541_v4 = vpop.f32.mrb[15].mxu1  ;;  %v2038_v1 = vld [vmem:[#allocation21 + $0xf8] sm:$0xff] }
0x18be   :  { %v2682_v2 = vpack.c.bf16 %v2038_v1, %v2037_v0  ;;  %v2022_v4 = vld [vmem:[#allocation21 + $0x78] sm:$0xff] }
0x18bf   :  { %v1673_v5 = vmin.f32 %v1669_v3, 0.0  ;;  %vm1672_vm13 = vcmp.gt.f32.partialorder %v1669_v3, 0.0 }
0x18c1   :  { %v1674_v7 = vmul.f32 1.442695, %v1673_v5 }
0x18c3   :  { %2782 = vpow2.f32 %v1674_v7  ;;  %v2042_v7 = vld [vmem:[#allocation22 + $0x10] sm:$0xff] }
0x18c4   :  { %v3749_v8 = vpop.f32.mrb[16].mxu1 }
0x18c5   :  { %v2552_v9 = vpop.f32.mrb[17].mxu1 }
0x18c6   :  { %v2043_v9 = vld [vmem:[#allocation22 + $0x18] sm:$0xff] }
0x18c7   :  { %v2652_v10 = vpack.c.bf16 %v2043_v9, %v2042_v7 }
0x18c9   :  { %2653 = vmatpush3.bf16.msra.mxu1 %v2652_v10 }
0x18ca   :  { %2686 = vmatprep.subr.bf16.mxu1 %v3128_v36 }
0x18cd   :  { %v2783_v12 = vpop.eup %2782 }
0x18ce   :  { %v2316_v13 = vadd.f32 -1.0, %v2783_v12  ;;  %v1694_v12 = vsub.s32 0, %v1693_v11 }
0x18d0   :  { %v1677_v21 = vsel %vm1672_vm13, %v1669_v3, %v2316_v13  ;;  %v2021_v3 = vld [vmem:[#allocation21 + $0x70] sm:$0xff]  ;;  %v1690_v13 = vld [vmem:[%s3800_s14] sm:$0x7] }
0x18d1   :  { %2319 = vmatmul.mubr.msk.f32.vlgmr.msra.gmra.mrb[10].mxu0 %vm1853_vm11, %v1677_v21  ;;  %2271 = vst.msk [vmem:[%s3807_s21] sm:$0x3] %vm2270_vm12, %v1677_v21  ;;  %v2684_v5 = vpack.c.bf16 %v2022_v4, %v2021_v3  ;;  %v1703_v22 = vrot.slane %v1690_v13, %v1702_v16 }
0x18d2   :  { %2554 = vmatpush3.msk.msra.mxu0 %vm257_vm0, %v1928_v14  ;;  %2555 = vmatprep.mubr.msk.f32.mxu0 %vm3129_vm7, %v3130_v39  ;;  %v1698_v14 = vsub.s32 1, %v1693_v11 }
0x18d3   :  { %2655 = vmatprep.subr.bf16.mxu0 %v2654_v15  ;;  %v1695_v15 = vrot.slane %v1690_v13, %v1694_v12  ;;  %v1845_v6 = vadd.f32 %v3749_v8, %v1703_v22 }
0x18d4   :  { %v1699_v20 = vrot.slane %v1690_v13, %v1698_v14 }
0x18d5   :  { %2556 = vmatmul.mubr.msk.f32.vlgmr.msra.gmra.mrb[12].mxu0 %vm250_vm2, %v1848_v25  ;;  %v1774_v21 = vadd.f32 %v3724_v52, %v1695_v15  ;;  %v2187_v52 = vld [vmem:[#allocation18] sm:$0xff] }
0x18d6   :  { %2657 = vmatpush3.bf16.msra.mxu0 %v2656_v26  ;;  %v1776_v24 = vadd.f32 %v3726_v53, %v1699_v20 }
0x18d7   :  { %2659 = vmatprep.subr.bf16.mxu0 %v2658_v27 }
0x18da   :  { %2661 = vmatpush3.bf16.msra.mxu0 %v2660_v37  ;;  %v2687_v37 = vpack.c.bf16 %v2188_v31, %v2187_v52 }
0x18db   :  { %2663 = vmatprep.subr.bf16.mxu0 %v2662_v32 }
0x18de   :  { %2665 = vmatpush3.bf16.msra.mxu0 %v2664_v38 }
0x18df   :  { %2667 = vmatprep.subr.bf16.mxu0 %v2666_v41 }
0x18e2   :  { %2669 = vmatpush3.bf16.msra.mxu0 %v2668_v46 }
0x18e3   :  { %2671 = vmatprep.subr.bf16.mxu0 %v2670_v47 }
0x18e6   :  { %2673 = vmatpush3.bf16.msra.mxu0 %v2672_v54 }
0x18e7   :  { %2675 = vmatprep.subr.bf16.mxu0 %v2674_v55 }
0x18ea   :  { %2677 = vmatpush3.bf16.msra.mxu0 %v2676_v58 }
0x18eb   :  { %2679 = vmatprep.subr.bf16.mxu0 %v2678_v59 }
0x18ee   :  { %2681 = vmatpush3.bf16.msra.mxu0 %v2680_v61 }
0x18ef   :  { %2683 = vmatprep.subr.bf16.mxu0 %v2682_v2 }
0x18f2   :  { %2685 = vmatpush3.bf16.msra.mxu0 %v2684_v5 }
0x19a4   :  { %v1923_v25 = vpop.f32.mrb[10].mxu0 }
0x19a5   :  { %v2005_v26 = vmul.f32 %v1923_v25, %v1774_v21  ;;  %v1925_v27 = vpop.f32.mrb[11].mxu0 }
0x19a6   :  { %v2006_v36 = vmul.f32 %v1925_v27, %v1776_v24 }
0x19a8   :  { %v2001_v28 = vpop.f32.mrb[12].mxu0  ;;  %2181 = vmatprep.mubr.f32.mxu0 %v2006_v36 }
0x19a9   :  { %v2039_v29 = vmul.f32 %v2001_v28, %v1845_v6  ;;  %v2557_v30 = vpop.f32.mrb[13].mxu0  ;;  %2182 = vmatmul.mubr.f32.vlgmr.msra.gmra.mrb[14].mxu0 %v2005_v26 }
0x19ab   :  { %2567 = vmatmul.mubr.msk.f32.vlgmr.msra.gmra.mrb[18].mxu1 %vm479_vm9, %v2039_v29 }
0x19ac   :  { %2573 = vmatprep.mubr.msk.f32.mxu1 %vm3129_vm7, %v3130_v39  ;;  %2688 = vmatpush3.bf16.msra.mxu1 %v2687_v37  ;;  %v2323_v39 = vld [vmem:[%s3829_s16] ss:$0 sm:$0xff] }
0x1a7c   :  { %v2422_v53 = vpop.f32.mrb[14].mxu0 }
0x1a7d   :  { %v2423_v32 = vpop.f32.mrb[15].mxu0 }
0x1a7e   :  { %v2424_v33 = vadd.f32 %v2423_v32, %v2422_v53  ;;  %v2113_v40 = vpop.f32.mrb[18].mxu1 }
0x1a7f   :  { %v2568_v34 = vpop.f32.mrb[19].mxu1 }
0x1a80   :  { %v2184_v8 = vadd.f32 %v2424_v33, %v2113_v40 }
0x1a82   :  { %2272 = vrot.lane.b32.xlu0 %v2184_v8, %s3117_s2  ;;  %2574 = vmatmul.mubr.msk.f32.vlgmr.msra.gmra.mrb[20].mxu1 %vm1853_vm11, %v2184_v8 }
0x1af4   :  { %v2273_v35 = vpop.permute.xlu0 %2272 }
0x1af5   :  { %2276 = vst.msk [vmem:[%s3807_s21] sm:$0x3] %vm2275_vm14, %v2273_v35 }
0x1b55   :  { %v2265_v38 = vpop.f32.mrb[20].mxu1 }
0x1b56   :  { %v2266_v41 = vadd.f32 %v2323_v39, %v2265_v38  ;;  %v2575_v42 = vpop.f32.mrb[21].mxu1 }
0x1b58   :  { %2278 = vrot.lane.b32.xlu1 %v2266_v41, %s3132_s23 }
0x1bca   :  { %v2279_v43 = vpop.permute.xlu1 %2278 }
0x1bcb   :  { %2282 = vst.msk [vmem:[%s3807_s21] sm:$0x3] %vm2281_vm15, %v2279_v43 }
0x1bcc   :  { %2287 = vsyncpa [#allocation3], 1 }
0x1bcd   :  { %2288 = vsyncpa [#allocation5], 1 }
0x1bce   :  { %2289 = vsyncpa [#allocation8], 1 }
0x1bcf   :  { %2290 = vsyncpa [#allocation11], 1 }
0x1bd0   :  { %2291 = vsyncpa [#allocation14], 1 }
0x1bd1   :  { %2292 = vsyncpa [#allocation17], 1 }
0x1bd2   :  { %2293 = vsyncpa [#allocation20], 1 }
0x1bd3   :  { %2294 = vsyncpa [#allocation23], 1 }

</bundles_post_ra>
